<compile_context>
chip_gen: v5e
topology: v5e:2x2
jax: 0.10.0
libtpu: 0.0.40
codegen_flags: <defaults>
</compile_context>

<pallas_src>
import jax
import jax.numpy as jnp
from jax import lax
from jax.experimental import pallas as pl
from jax.experimental.pallas import tpu as pltpu


def _round_up(x, m):
    return (x + m - 1) // m * m


def _vmem_limit_bytes(frac=0.75, fallback=64 * 1024 * 1024):
    """Per-generation VMEM budget (v7x has 64 MiB physical vs 128 MiB)."""
    try:
        cap = pltpu.get_tpu_info().vmem_capacity_bytes
        return min(int(cap * frac), 100 * 1024 * 1024)
    except Exception:  # pragma: no cover - conservative fallback
        return fallback


# --------------------------------------------------------------------------
# Kernel
# --------------------------------------------------------------------------
def bottleneck_kernel(x_ref, halo_ref, w1_ref, b1_ref, w3_ref, b2_ref,
                      w2_ref, b3_ref, o_ref, fat_ref):
    # x_ref:    [1, TH, W, Cip]  bf16 (one row tile of one batch element)
    # halo_ref: [1, 2,  W, Cip]  bf16 (row above / row below the tile; zero
    #                                  rows at the image top/bottom)
    # w1_ref: [Cip, Pp]    bf16   b1_ref: [1, Pp]  f32
    # w3_ref: [3, 3*Pp, Pp] bf16  b2_ref: [1, Pp]  f32   (layout [dh, dw*Pp+ci, co])
    # w2_ref: [Pp, Cop]    bf16   b3_ref: [1, Cop] f32
    # fat_ref: VMEM scratch [TH+2, W, 3*Pp] bf16 (dw-im2col of h1, incl. halo)
    TH, W = x_ref.shape[1], x_ref.shape[2]
    Cip = x_ref.shape[3]
    Pp = w1_ref.shape[1]
    Cop = w2_ref.shape[1]
    rt = pl.program_id(1)
    nt = pl.num_programs(1)

    # --- conv1x1 (BN folded into w1) + bias + ReLU --------------------------
    xb = x_ref[0].reshape(TH * W, Cip)                       # bf16
    h1m = jnp.dot(xb, w1_ref[...], preferred_element_type=jnp.float32)
    h1m = jnp.maximum(h1m + b1_ref[...], 0.0)
    h1m = h1m.astype(jnp.bfloat16).reshape(TH, W, Pp)

    xh = halo_ref[0].reshape(2 * W, Cip)                     # bf16
    h1h = jnp.dot(xh, w1_ref[...], preferred_element_type=jnp.float32)
    h1h = jnp.maximum(h1h + b1_ref[...], 0.0)
    h1h = h1h.astype(jnp.bfloat16).reshape(2, W, Pp)

    # --- stage into the fat scratch: fat[r, w, dw*Pp+ci] = h1[r, w+dw-1, ci] -
    # Every element is (re)written each grid step -> megacore-safe.
    def stage(rows, r0, nr):
        # rows: (nr, W, Pp) bf16
        fat_ref[r0:r0 + nr, :, Pp:2 * Pp] = rows                       # dw = 1
        fat_ref[r0:r0 + nr, 1:W, 0:Pp] = rows[:, 0:W - 1, :]           # dw = 0
        fat_ref[r0:r0 + nr, 0:1, 0:Pp] = jnp.zeros((nr, 1, Pp), jnp.bfloat16)
        fat_ref[r0:r0 + nr, 0:W - 1, 2 * Pp:3 * Pp] = rows[:, 1:W, :]  # dw = 2
        fat_ref[r0:r0 + nr, W - 1:W, 2 * Pp:3 * Pp] = jnp.zeros(
            (nr, 1, Pp), jnp.bfloat16)

    stage(h1m, 1, TH)              # tile rows -> fat rows 1..TH
    stage(h1h[0:1], 0, 1)          # halo above -> fat row 0
    stage(h1h[1:2], TH + 1, 1)     # halo below -> fat row TH+1

    # At the image top/bottom edge the conv3x3 padding of h1 is zero (not the
    # conv1x1 of a zero x row), so overwrite those halo rows with zeros.
    @pl.when(rt == 0)
    def _():
        fat_ref[0:1, :, :] = jnp.zeros((1, W, 3 * Pp), jnp.bfloat16)

    @pl.when(rt == nt - 1)
    def _():
        fat_ref[TH + 1:TH + 2, :, :] = jnp.zeros((1, W, 3 * Pp), jnp.bfloat16)

    # --- conv3x3 via dw-im2col (K = 3*Pp), 3 matmuls over dh ----------------
    acc = jnp.dot(fat_ref[0:TH].reshape(TH * W, 3 * Pp), w3_ref[0],
                  preferred_element_type=jnp.float32)
    acc = acc + jnp.dot(fat_ref[1:TH + 1].reshape(TH * W, 3 * Pp), w3_ref[1],
                        preferred_element_type=jnp.float32)
    acc = acc + jnp.dot(fat_ref[2:TH + 2].reshape(TH * W, 3 * Pp), w3_ref[2],
                        preferred_element_type=jnp.float32)
    h2 = jnp.maximum(acc + b2_ref[...], 0.0).astype(jnp.bfloat16)

    # --- conv1x1 expansion + bias + residual + ReLU (f32 epilogue) ----------
    h3 = jnp.dot(h2, w2_ref[...], preferred_element_type=jnp.float32)
    h3 = h3 + b3_ref[...]
    res = x_ref[0].reshape(TH * W, Cip).astype(jnp.float32)   # re-read, no long f32 live range
    out = jnp.maximum(h3 + res, 0.0)
    o_ref[0] = out.reshape(TH, W, Cop)


# --------------------------------------------------------------------------
# Parameter preparation: fold BN, pad channels to lane width, cast to bf16
# --------------------------------------------------------------------------
def prepare_params(params, lane=128):
    w1, s1, b1 = params["w1"], params["s1"], params["b1"]
    w3, s2, b2 = params["w3"], params["s2"], params["b2"]
    w2, s3, b3 = params["w2"], params["s3"], params["b3"]
    Cin, P = w1.shape
    Cout = w2.shape[1]
    Cip, Pp, Cop = _round_up(Cin, lane), _round_up(P, lane), _round_up(Cout, lane)

    # fold inference-mode BN scale into the conv output channels
    w1f = w1 * s1                     # (Cin, P)
    w3f = w3 * s2[0]                  # (3,3,P,P) * (P,)
    w2f = w2 * s3                     # (P, Cout)

    w1p = jnp.zeros((Cip, Pp), jnp.float32).at[:Cin, :P].set(w1f).astype(jnp.bfloat16)
    w2p = jnp.zeros((Pp, Cop), jnp.float32).at[:P, :Cout].set(w2f).astype(jnp.bfloat16)
    w3p = jnp.zeros((3, 3, Pp, Pp), jnp.float32).at[:, :, :P, :P].set(w3f).astype(jnp.bfloat16)

    def padb(b, c, cp):
        return jnp.zeros((1, cp), jnp.float32).at[:, :c].set(b)

    return dict(
        w1=w1p, b1=padb(b1, P, Pp),
        w3=w3p.reshape(3, 3 * Pp, Pp),      # kernel layout: [dh, dw*Pp+cin, cout]
        w3_hwio=w3p,                        # HWIO form for the matched reference
        b2=padb(b2, P, Pp),
        w2=w2p, b3=padb(b3, Cout, Cop),
        dims=(Cin, P, Cout, Cip, Pp, Cop))


# --------------------------------------------------------------------------
# Forward wrappers
# --------------------------------------------------------------------------
def bottleneck_forward_nhwc(x_nhwc, prep, row_tile=8):
    Cin, P, Cout, Cip, Pp, Cop = prep["dims"]
    N, H, W, C = x_nhwc.shape
    assert C == Cin and Cin == Cout and Cip == Cop, \
        "downsample=None requires in_planes == planes * expansion"

    TH = row_tile if (H % row_tile == 0) else H
    nt = H // TH

    # bf16 activations (halves HBM traffic + input double-buffer VMEM)
    xb = x_nhwc.astype(jnp.bfloat16)
    if Cip != Cin:
        xb = jnp.zeros((N, H, W, Cip), jnp.bfloat16).at[..., :Cin].set(xb)

    # 1-row halo above/below each row tile; zero rows at the image edges.
    xz = jnp.pad(xb, ((0, 0), (1, 1), (0, 0), (0, 0)))
    halo_top = xz[:, 0:H:TH]                       # row rt*TH - 1  (N, nt, W, Cip)
    halo_bot = xz[:, TH + 1:H + 2:TH]              # row rt*TH + TH (N, nt, W, Cip)
    halo = jnp.stack([halo_top, halo_bot], axis=2).reshape(N, nt * 2, W, Cip)

    def full(shape):
        return pl.BlockSpec(shape, lambda n, r, s=len(shape): (0,) * s)

    out = pl.pallas_call(
        bottleneck_kernel,
        out_shape=jax.ShapeDtypeStruct((N, H, W, Cop), jnp.float32),
        grid=(N, nt),
        in_specs=[
            pl.BlockSpec((1, TH, W, Cip), lambda n, r: (n, r, 0, 0)),
            pl.BlockSpec((1, 2, W, Cip), lambda n, r: (n, r, 0, 0)),
            full((Cip, Pp)), full((1, Pp)),
            full((3, 3 * Pp, Pp)), full((1, Pp)),
            full((Pp, Cop)), full((1, Cop)),
        ],
        out_specs=pl.BlockSpec((1, TH, W, Cop), lambda n, r: (n, r, 0, 0)),
        scratch_shapes=[pltpu.VMEM((TH + 2, W, 3 * Pp), jnp.bfloat16)],
        compiler_params=pltpu.CompilerParams(
            dimension_semantics=("parallel", "parallel"),
            vmem_limit_bytes=_vmem_limit_bytes()),
    )(xb, halo, prep["w1"], prep["b1"], prep["w3"], prep["b2"],
      prep["w2"], prep["b3"])

    return out[..., :Cout]


def bottleneck_forward(x_nchw, params, row_tile=8):
    """PyTorch-parity entry: NCHW in, NCHW out.  (Prefer NHWC end-to-end; the
    transposes here are a compatibility shim only.)"""
    prep = prepare_params(params)
    x = jnp.transpose(x_nchw, (0, 2, 3, 1))
    out = bottleneck_forward_nhwc(x, prep, row_tile=row_tile)
    return jnp.transpose(out, (0, 3, 1, 2))


# --------------------------------------------------------------------------
# References
# --------------------------------------------------------------------------
def ref_forward_matched(x_nchw, prep):
    """Plain-JAX reference using the same folded/padded bf16 weights, bf16
    activations and f32 accumulation -- numerically matches the kernel tightly."""
    Cin, P, Cout, Cip, Pp, Cop = prep["dims"]
    x = jnp.transpose(x_nchw, (0, 2, 3, 1))
    N, H, W, _ = x.shape
    xb = jnp.zeros((N, H, W, Cip), jnp.bfloat16).at[..., :Cin].set(
        x.astype(jnp.bfloat16))

    def conv(inp, w, pad):
        return lax.conv_general_dilated(
            inp, w, (1, 1), pad, dimension_numbers=("NHWC", "HWIO", "NHWC"),
            preferred_element_type=jnp.float32)

    h = conv(xb, prep["w1"][None, None], "VALID")
    h = jnp.maximum(h + prep["b1"], 0.0)
    h = conv(h.astype(jnp.bfloat16), prep["w3_hwio"], "SAME")
    h = jnp.maximum(h + prep["b2"], 0.0)
    h = conv(h.astype(jnp.bfloat16), prep["w2"][None, None], "VALID")
    h = h + prep["b3"]
    out = jnp.maximum(h + xb.astype(jnp.float32), 0.0)[..., :Cout]
    return jnp.transpose(out, (0, 3, 1, 2))


def ref_forward_fp32(x_nchw, params):
    """Original-semantics f32 reference (eval-mode BN as scale/shift)."""
    x = jnp.transpose(x_nchw, (0, 2, 3, 1))

    def conv(inp, w, pad):
        return lax.conv_general_dilated(
            inp, w, (1, 1), pad, dimension_numbers=("NHWC", "HWIO", "NHWC"))

    h = conv(x, params["w1"][None, None], "VALID")
    h = jnp.maximum(h * params["s1"] + params["b1"], 0.0)
    h = conv(h, params["w3"], "SAME")
    h = jnp.maximum(h * params["s2"] + params["b2"], 0.0)
    h = conv(h, params["w2"][None, None], "VALID")
    h = h * params["s3"] + params["b3"]
    out = jnp.maximum(h + x, 0.0)
    return jnp.transpose(out, (0, 3, 1, 2))


# --------------------------------------------------------------------------
# Param construction (matches PyTorch module: conv weights + eval-mode BN)
# --------------------------------------------------------------------------
def make_params(key, in_planes, planes, expansion=4, eps=1e-5):
    out_planes = planes * expansion
    ks = jax.random.split(key, 16)

    def bn_fold(kg, kb, km, kv, c):
        gamma = 1.0 + 0.1 * jax.random.normal(kg, (1, c), jnp.float32)
        beta = 0.1 * jax.random.normal(kb, (1, c), jnp.float32)
        mean = 0.1 * jax.random.normal(km, (1, c), jnp.float32)
        var = 1.0 + 0.1 * jnp.abs(jax.random.normal(kv, (1, c), jnp.float32))
        scale = gamma / jnp.sqrt(var + eps)
        shift = beta - mean * scale
        return scale, shift

    w1 = 0.1 * jax.random.normal(ks[0], (in_planes, planes), jnp.float32)
    s1, b1 = bn_fold(ks[1], ks[2], ks[3], ks[4], planes)
    w3 = 0.1 * jax.random.normal(ks[5], (3, 3, planes, planes), jnp.float32)
    s2, b2 = bn_fold(ks[6], ks[7], ks[8], ks[9], planes)
    w2 = 0.1 * jax.random.normal(ks[10], (planes, out_planes), jnp.float32)
    s3, b3 = bn_fold(ks[11], ks[12], ks[13], ks[14], out_planes)
    return dict(w1=w1, s1=s1, b1=b1, w3=w3, s2=s2, b2=b2,
                w2=w2, s3=s3, b3=b3)


if __name__ == "__main__":
    # in_planes = planes * expansion so the identity residual is valid
    N, planes, expansion, H, W = 2, 4, 4, 16, 16
    in_planes = planes * expansion  # 16

    key = jax.random.PRNGKey(0)
    kx, kp = jax.random.split(key)
    x = jax.random.normal(kx, (N, in_planes, H, W), jnp.float32)
    params = make_params(kp, in_planes, planes, expansion)

    out = jax.block_until_ready(bottleneck_forward(x, params, row_tile=8))
    assert out.shape == (N, in_planes, H, W)

    # tight check vs a reference that uses the same bf16 weights/activations
    prep = prepare_params(params)
    ref_m = jax.block_until_ready(ref_forward_matched(x, prep))
    assert jnp.allclose(out, ref_m, rtol=1e-3, atol=1e-3), "mismatch vs bf16-matched ref"

    # loose sanity check vs the original f32 eval-mode-BN semantics
    ref_f = jax.block_until_ready(ref_forward_fp32(x, params))
    assert jnp.allclose(out, ref_f, rtol=5e-2, atol=5e-2), "mismatch vs f32 ref"

    print("KERNEL_OK")
</pallas_src>

<mosaic_0001>
module attributes {stable_mosaic.version = 11 : i64} {
  func.func @bottleneck_kernel(%arg0: i32, %arg1: i32, %arg2: memref<1x8x16x128xbf16, #tpu.memory_space<vmem>>, %arg3: memref<1x2x16x128xbf16, #tpu.memory_space<vmem>>, %arg4: memref<128x128xbf16, #tpu.memory_space<vmem>>, %arg5: memref<1x128xf32, #tpu.memory_space<vmem>>, %arg6: memref<3x384x128xbf16, #tpu.memory_space<vmem>>, %arg7: memref<1x128xf32, #tpu.memory_space<vmem>>, %arg8: memref<128x128xbf16, #tpu.memory_space<vmem>>, %arg9: memref<1x128xf32, #tpu.memory_space<vmem>>, %arg10: memref<1x8x16x128xf32, #tpu.memory_space<vmem>>, %arg11: memref<10x16x384xbf16, #tpu.memory_space<vmem>>) attributes {dimension_semantics = [#tpu.dimension_semantics<parallel>, #tpu.dimension_semantics<parallel>], iteration_bounds = array<i64: 2, 2>, scalar_prefetch = 0 : i64, scratch_operands = 1 : i64, tpu.core_type = #tpu.core_type<tc>, window_params = [{transform_indices = @transform_0, window_bounds = array<i64: 1, 8, 16, 128>}, {transform_indices = @transform_1, window_bounds = array<i64: 1, 2, 16, 128>}, {pipeline_mode = #tpu.pipeline_mode<synchronous>, transform_indices = @transform_2, window_bounds = array<i64: 128, 128>}, {pipeline_mode = #tpu.pipeline_mode<synchronous>, transform_indices = @transform_3, window_bounds = array<i64: 1, 128>}, {pipeline_mode = #tpu.pipeline_mode<synchronous>, transform_indices = @transform_4, window_bounds = array<i64: 3, 384, 128>}, {pipeline_mode = #tpu.pipeline_mode<synchronous>, transform_indices = @transform_5, window_bounds = array<i64: 1, 128>}, {pipeline_mode = #tpu.pipeline_mode<synchronous>, transform_indices = @transform_6, window_bounds = array<i64: 128, 128>}, {pipeline_mode = #tpu.pipeline_mode<synchronous>, transform_indices = @transform_7, window_bounds = array<i64: 1, 128>}, {transform_indices = @transform_8, window_bounds = array<i64: 1, 8, 16, 128>}]} {
    %c0 = arith.constant 0 : index
    %c0_0 = arith.constant 0 : index
    %c0_1 = arith.constant 0 : index
    %c0_2 = arith.constant 0 : index
    %0 = vector.load %arg2[%c0, %c0_0, %c0_1, %c0_2] : memref<1x8x16x128xbf16, #tpu.memory_space<vmem>>, vector<1x8x16x128xbf16>
    %1 = vector.shape_cast %0 : vector<1x8x16x128xbf16> to vector<8x16x128xbf16>
    %2 = vector.shape_cast %1 : vector<8x16x128xbf16> to vector<128x128xbf16>
    %c0_3 = arith.constant 0 : index
    %c0_4 = arith.constant 0 : index
    %3 = vector.load %arg4[%c0_3, %c0_4] : memref<128x128xbf16, #tpu.memory_space<vmem>>, vector<128x128xbf16>
    %cst = arith.constant dense<0.000000e+00> : vector<128x128xf32>
    %4 = tpu.matmul %2, %3, %cst {dimension_numbers = #tpu.dot_dimension_numbers<[1], [0], [0], [1], [0, 0, 1, 1], [], []>} : vector<128x128xbf16>, vector<128x128xbf16>, vector<128x128xf32> -> vector<128x128xf32>
    %c0_5 = arith.constant 0 : index
    %c0_6 = arith.constant 0 : index
    %5 = vector.load %arg5[%c0_5, %c0_6] : memref<1x128xf32, #tpu.memory_space<vmem>>, vector<1x128xf32>
    %6 = vector.broadcast %5 : vector<1x128xf32> to vector<128x128xf32>
    %7 = arith.addf %4, %6 : vector<128x128xf32>
    %cst_7 = arith.constant 0.000000e+00 : f32
    %8 = vector.broadcast %cst_7 : f32 to vector<128x128xf32>
    %9 = arith.maximumf %7, %8 : vector<128x128xf32>
    %10 = arith.truncf %9 : vector<128x128xf32> to vector<128x128xbf16>
    %11 = vector.shape_cast %10 : vector<128x128xbf16> to vector<8x16x128xbf16>
    %c0_8 = arith.constant 0 : index
    %c0_9 = arith.constant 0 : index
    %c0_10 = arith.constant 0 : index
    %c0_11 = arith.constant 0 : index
    %12 = vector.load %arg3[%c0_8, %c0_9, %c0_10, %c0_11] : memref<1x2x16x128xbf16, #tpu.memory_space<vmem>>, vector<1x2x16x128xbf16>
    %13 = vector.shape_cast %12 : vector<1x2x16x128xbf16> to vector<2x16x128xbf16>
    %14 = vector.shape_cast %13 : vector<2x16x128xbf16> to vector<32x128xbf16>
    %c0_12 = arith.constant 0 : index
    %c0_13 = arith.constant 0 : index
    %15 = vector.load %arg4[%c0_12, %c0_13] : memref<128x128xbf16, #tpu.memory_space<vmem>>, vector<128x128xbf16>
    %cst_14 = arith.constant dense<0.000000e+00> : vector<32x128xf32>
    %16 = tpu.matmul %14, %15, %cst_14 {dimension_numbers = #tpu.dot_dimension_numbers<[1], [0], [0], [1], [0, 0, 1, 1], [], []>} : vector<32x128xbf16>, vector<128x128xbf16>, vector<32x128xf32> -> vector<32x128xf32>
    %c0_15 = arith.constant 0 : index
    %c0_16 = arith.constant 0 : index
    %17 = vector.load %arg5[%c0_15, %c0_16] : memref<1x128xf32, #tpu.memory_space<vmem>>, vector<1x128xf32>
    %18 = vector.broadcast %17 : vector<1x128xf32> to vector<32x128xf32>
    %19 = arith.addf %16, %18 : vector<32x128xf32>
    %cst_17 = arith.constant 0.000000e+00 : f32
    %20 = vector.broadcast %cst_17 : f32 to vector<32x128xf32>
    %21 = arith.maximumf %19, %20 : vector<32x128xf32>
    %22 = arith.truncf %21 : vector<32x128xf32> to vector<32x128xbf16>
    %23 = vector.shape_cast %22 : vector<32x128xbf16> to vector<2x16x128xbf16>
    %c1 = arith.constant 1 : index
    %c0_18 = arith.constant 0 : index
    %c128 = arith.constant 128 : index
    %24 = vector.load %arg11[%c1, %c0_18, %c128] : memref<10x16x384xbf16, #tpu.memory_space<vmem>>, vector<8x16x128xbf16>
    tpu.vector_store %arg11[%c1, %c0_18, %c128], %11 {strides = array<i32>} : memref<10x16x384xbf16, #tpu.memory_space<vmem>>, vector<8x16x128xbf16>,
    %25 = vector.extract_strided_slice %11 {offsets = [0, 0, 0], sizes = [8, 15, 128], strides = [1, 1, 1]} : vector<8x16x128xbf16> to vector<8x15x128xbf16>
    %c1_19 = arith.constant 1 : index
    %c1_20 = arith.constant 1 : index
    %c0_21 = arith.constant 0 : index
    %26 = vector.load %arg11[%c1_19, %c1_20, %c0_21] : memref<10x16x384xbf16, #tpu.memory_space<vmem>>, vector<8x15x128xbf16>
    tpu.vector_store %arg11[%c1_19, %c1_20, %c0_21], %25 {strides = array<i32>} : memref<10x16x384xbf16, #tpu.memory_space<vmem>>, vector<8x15x128xbf16>,
    %cst_22 = arith.constant 0.000000e+00 : bf16
    %27 = vector.broadcast %cst_22 : bf16 to vector<8x1x128xbf16>
    %c1_23 = arith.constant 1 : index
    %c0_24 = arith.constant 0 : index
    %c0_25 = arith.constant 0 : index
    %28 = vector.load %arg11[%c1_23, %c0_24, %c0_25] : memref<10x16x384xbf16, #tpu.memory_space<vmem>>, vector<8x1x128xbf16>
    tpu.vector_store %arg11[%c1_23, %c0_24, %c0_25], %27 {strides = array<i32>} : memref<10x16x384xbf16, #tpu.memory_space<vmem>>, vector<8x1x128xbf16>,
    %29 = vector.extract_strided_slice %11 {offsets = [0, 1, 0], sizes = [8, 15, 128], strides = [1, 1, 1]} : vector<8x16x128xbf16> to vector<8x15x128xbf16>
    %c1_26 = arith.constant 1 : index
    %c0_27 = arith.constant 0 : index
    %c256 = arith.constant 256 : index
    %30 = vector.load %arg11[%c1_26, %c0_27, %c256] : memref<10x16x384xbf16, #tpu.memory_space<vmem>>, vector<8x15x128xbf16>
    tpu.vector_store %arg11[%c1_26, %c0_27, %c256], %29 {strides = array<i32>} : memref<10x16x384xbf16, #tpu.memory_space<vmem>>, vector<8x15x128xbf16>,
    %cst_28 = arith.constant 0.000000e+00 : bf16
    %31 = vector.broadcast %cst_28 : bf16 to vector<8x1x128xbf16>
    %c1_29 = arith.constant 1 : index
    %c15 = arith.constant 15 : index
    %c256_30 = arith.constant 256 : index
    %32 = vector.load %arg11[%c1_29, %c15, %c256_30] : memref<10x16x384xbf16, #tpu.memory_space<vmem>>, vector<8x1x128xbf16>
    tpu.vector_store %arg11[%c1_29, %c15, %c256_30], %31 {strides = array<i32>} : memref<10x16x384xbf16, #tpu.memory_space<vmem>>, vector<8x1x128xbf16>,
    %33 = vector.extract_strided_slice %23 {offsets = [0, 0, 0], sizes = [1, 16, 128], strides = [1, 1, 1]} : vector<2x16x128xbf16> to vector<1x16x128xbf16>
    %c0_31 = arith.constant 0 : index
    %c0_32 = arith.constant 0 : index
    %c128_33 = arith.constant 128 : index
    %34 = vector.load %arg11[%c0_31, %c0_32, %c128_33] : memref<10x16x384xbf16, #tpu.memory_space<vmem>>, vector<1x16x128xbf16>
    tpu.vector_store %arg11[%c0_31, %c0_32, %c128_33], %33 {strides = array<i32>} : memref<10x16x384xbf16, #tpu.memory_space<vmem>>, vector<1x16x128xbf16>,
    %35 = vector.extract_strided_slice %33 {offsets = [0, 0, 0], sizes = [1, 15, 128], strides = [1, 1, 1]} : vector<1x16x128xbf16> to vector<1x15x128xbf16>
    %c0_34 = arith.constant 0 : index
    %c1_35 = arith.constant 1 : index
    %c0_36 = arith.constant 0 : index
    %36 = vector.load %arg11[%c0_34, %c1_35, %c0_36] : memref<10x16x384xbf16, #tpu.memory_space<vmem>>, vector<1x15x128xbf16>
    tpu.vector_store %arg11[%c0_34, %c1_35, %c0_36], %35 {strides = array<i32>} : memref<10x16x384xbf16, #tpu.memory_space<vmem>>, vector<1x15x128xbf16>,
    %cst_37 = arith.constant 0.000000e+00 : bf16
    %37 = vector.broadcast %cst_37 : bf16 to vector<1x1x128xbf16>
    %c0_38 = arith.constant 0 : index
    %c0_39 = arith.constant 0 : index
    %c0_40 = arith.constant 0 : index
    %38 = vector.load %arg11[%c0_38, %c0_39, %c0_40] : memref<10x16x384xbf16, #tpu.memory_space<vmem>>, vector<1x1x128xbf16>
    tpu.vector_store %arg11[%c0_38, %c0_39, %c0_40], %37 {strides = array<i32>} : memref<10x16x384xbf16, #tpu.memory_space<vmem>>, vector<1x1x128xbf16>,
    %39 = vector.extract_strided_slice %33 {offsets = [0, 1, 0], sizes = [1, 15, 128], strides = [1, 1, 1]} : vector<1x16x128xbf16> to vector<1x15x128xbf16>
    %c0_41 = arith.constant 0 : index
    %c0_42 = arith.constant 0 : index
    %c256_43 = arith.constant 256 : index
    %40 = vector.load %arg11[%c0_41, %c0_42, %c256_43] : memref<10x16x384xbf16, #tpu.memory_space<vmem>>, vector<1x15x128xbf16>
    tpu.vector_store %arg11[%c0_41, %c0_42, %c256_43], %39 {strides = array<i32>} : memref<10x16x384xbf16, #tpu.memory_space<vmem>>, vector<1x15x128xbf16>,
    %cst_44 = arith.constant 0.000000e+00 : bf16
    %41 = vector.broadcast %cst_44 : bf16 to vector<1x1x128xbf16>
    %c0_45 = arith.constant 0 : index
    %c15_46 = arith.constant 15 : index
    %c256_47 = arith.constant 256 : index
    %42 = vector.load %arg11[%c0_45, %c15_46, %c256_47] : memref<10x16x384xbf16, #tpu.memory_space<vmem>>, vector<1x1x128xbf16>
    tpu.vector_store %arg11[%c0_45, %c15_46, %c256_47], %41 {strides = array<i32>} : memref<10x16x384xbf16, #tpu.memory_space<vmem>>, vector<1x1x128xbf16>,
    %43 = vector.extract_strided_slice %23 {offsets = [1, 0, 0], sizes = [1, 16, 128], strides = [1, 1, 1]} : vector<2x16x128xbf16> to vector<1x16x128xbf16>
    %c9 = arith.constant 9 : index
    %c0_48 = arith.constant 0 : index
    %c128_49 = arith.constant 128 : index
    %44 = vector.load %arg11[%c9, %c0_48, %c128_49] : memref<10x16x384xbf16, #tpu.memory_space<vmem>>, vector<1x16x128xbf16>
    tpu.vector_store %arg11[%c9, %c0_48, %c128_49], %43 {strides = array<i32>} : memref<10x16x384xbf16, #tpu.memory_space<vmem>>, vector<1x16x128xbf16>,
    %45 = vector.extract_strided_slice %43 {offsets = [0, 0, 0], sizes = [1, 15, 128], strides = [1, 1, 1]} : vector<1x16x128xbf16> to vector<1x15x128xbf16>
    %c9_50 = arith.constant 9 : index
    %c1_51 = arith.constant 1 : index
    %c0_52 = arith.constant 0 : index
    %46 = vector.load %arg11[%c9_50, %c1_51, %c0_52] : memref<10x16x384xbf16, #tpu.memory_space<vmem>>, vector<1x15x128xbf16>
    tpu.vector_store %arg11[%c9_50, %c1_51, %c0_52], %45 {strides = array<i32>} : memref<10x16x384xbf16, #tpu.memory_space<vmem>>, vector<1x15x128xbf16>,
    %cst_53 = arith.constant 0.000000e+00 : bf16
    %47 = vector.broadcast %cst_53 : bf16 to vector<1x1x128xbf16>
    %c9_54 = arith.constant 9 : index
    %c0_55 = arith.constant 0 : index
    %c0_56 = arith.constant 0 : index
    %48 = vector.load %arg11[%c9_54, %c0_55, %c0_56] : memref<10x16x384xbf16, #tpu.memory_space<vmem>>, vector<1x1x128xbf16>
    tpu.vector_store %arg11[%c9_54, %c0_55, %c0_56], %47 {strides = array<i32>} : memref<10x16x384xbf16, #tpu.memory_space<vmem>>, vector<1x1x128xbf16>,
    %49 = vector.extract_strided_slice %43 {offsets = [0, 1, 0], sizes = [1, 15, 128], strides = [1, 1, 1]} : vector<1x16x128xbf16> to vector<1x15x128xbf16>
    %c9_57 = arith.constant 9 : index
    %c0_58 = arith.constant 0 : index
    %c256_59 = arith.constant 256 : index
    %50 = vector.load %arg11[%c9_57, %c0_58, %c256_59] : memref<10x16x384xbf16, #tpu.memory_space<vmem>>, vector<1x15x128xbf16>
    tpu.vector_store %arg11[%c9_57, %c0_58, %c256_59], %49 {strides = array<i32>} : memref<10x16x384xbf16, #tpu.memory_space<vmem>>, vector<1x15x128xbf16>,
    %cst_60 = arith.constant 0.000000e+00 : bf16
    %51 = vector.broadcast %cst_60 : bf16 to vector<1x1x128xbf16>
    %c9_61 = arith.constant 9 : index
    %c15_62 = arith.constant 15 : index
    %c256_63 = arith.constant 256 : index
    %52 = vector.load %arg11[%c9_61, %c15_62, %c256_63] : memref<10x16x384xbf16, #tpu.memory_space<vmem>>, vector<1x1x128xbf16>
    tpu.vector_store %arg11[%c9_61, %c15_62, %c256_63], %51 {strides = array<i32>} : memref<10x16x384xbf16, #tpu.memory_space<vmem>>, vector<1x1x128xbf16>,
    %c0_i32 = arith.constant 0 : i32
    %53 = arith.cmpi eq, %arg1, %c0_i32 : i32
    %54 = arith.extui %53 : i1 to i32
    %c0_i32_64 = arith.constant 0 : i32
    %55 = arith.cmpi ne, %54, %c0_i32_64 : i32
    scf.if %55 {
      %cst_103 = arith.constant 0.000000e+00 : bf16
      %98 = vector.broadcast %cst_103 : bf16 to vector<1x16x384xbf16>
      %c0_104 = arith.constant 0 : index
      %c0_105 = arith.constant 0 : index
      %c0_106 = arith.constant 0 : index
      %99 = vector.load %arg11[%c0_104, %c0_105, %c0_106] : memref<10x16x384xbf16, #tpu.memory_space<vmem>>, vector<1x16x384xbf16>
      tpu.vector_store %arg11[%c0_104, %c0_105, %c0_106], %98 {strides = array<i32>} : memref<10x16x384xbf16, #tpu.memory_space<vmem>>, vector<1x16x384xbf16>,
    } else {
    }
    %c1_i32 = arith.constant 1 : i32
    %56 = arith.cmpi eq, %arg1, %c1_i32 : i32
    %57 = arith.extui %56 : i1 to i32
    %c0_i32_65 = arith.constant 0 : i32
    %58 = arith.cmpi ne, %57, %c0_i32_65 : i32
    scf.if %58 {
      %cst_103 = arith.constant 0.000000e+00 : bf16
      %98 = vector.broadcast %cst_103 : bf16 to vector<1x16x384xbf16>
      %c9_104 = arith.constant 9 : index
      %c0_105 = arith.constant 0 : index
      %c0_106 = arith.constant 0 : index
      %99 = vector.load %arg11[%c9_104, %c0_105, %c0_106] : memref<10x16x384xbf16, #tpu.memory_space<vmem>>, vector<1x16x384xbf16>
      tpu.vector_store %arg11[%c9_104, %c0_105, %c0_106], %98 {strides = array<i32>} : memref<10x16x384xbf16, #tpu.memory_space<vmem>>, vector<1x16x384xbf16>,
    } else {
    }
    %c0_66 = arith.constant 0 : index
    %c0_67 = arith.constant 0 : index
    %c0_68 = arith.constant 0 : index
    %59 = vector.load %arg11[%c0_66, %c0_67, %c0_68] : memref<10x16x384xbf16, #tpu.memory_space<vmem>>, vector<8x16x384xbf16>
    %60 = vector.shape_cast %59 : vector<8x16x384xbf16> to vector<128x384xbf16>
    %c0_69 = arith.constant 0 : index
    %c0_70 = arith.constant 0 : index
    %c0_71 = arith.constant 0 : index
    %61 = vector.load %arg6[%c0_69, %c0_70, %c0_71] : memref<3x384x128xbf16, #tpu.memory_space<vmem>>, vector<1x384x128xbf16>
    %62 = vector.shape_cast %61 : vector<1x384x128xbf16> to vector<384x128xbf16>
    %cst_72 = arith.constant dense<0.000000e+00> : vector<128x128xf32>
    %63 = tpu.matmul %60, %62, %cst_72 {dimension_numbers = #tpu.dot_dimension_numbers<[1], [0], [0], [1], [0, 0, 1, 1], [], []>} : vector<128x384xbf16>, vector<384x128xbf16>, vector<128x128xf32> -> vector<128x128xf32>
    %c1_73 = arith.constant 1 : index
    %c0_74 = arith.constant 0 : index
    %c0_75 = arith.constant 0 : index
    %64 = vector.load %arg11[%c1_73, %c0_74, %c0_75] : memref<10x16x384xbf16, #tpu.memory_space<vmem>>, vector<8x16x384xbf16>
    %65 = vector.shape_cast %64 : vector<8x16x384xbf16> to vector<128x384xbf16>
    %c1_76 = arith.constant 1 : index
    %c0_77 = arith.constant 0 : index
    %c0_78 = arith.constant 0 : index
    %66 = vector.load %arg6[%c1_76, %c0_77, %c0_78] : memref<3x384x128xbf16, #tpu.memory_space<vmem>>, vector<1x384x128xbf16>
    %67 = vector.shape_cast %66 : vector<1x384x128xbf16> to vector<384x128xbf16>
    %cst_79 = arith.constant dense<0.000000e+00> : vector<128x128xf32>
    %68 = tpu.matmul %65, %67, %cst_79 {dimension_numbers = #tpu.dot_dimension_numbers<[1], [0], [0], [1], [0, 0, 1, 1], [], []>} : vector<128x384xbf16>, vector<384x128xbf16>, vector<128x128xf32> -> vector<128x128xf32>
    %69 = arith.addf %63, %68 : vector<128x128xf32>
    %c2 = arith.constant 2 : index
    %c0_80 = arith.constant 0 : index
    %c0_81 = arith.constant 0 : index
    %70 = vector.load %arg11[%c2, %c0_80, %c0_81] : memref<10x16x384xbf16, #tpu.memory_space<vmem>>, vector<8x16x384xbf16>
    %71 = vector.shape_cast %70 : vector<8x16x384xbf16> to vector<128x384xbf16>
    %c2_82 = arith.constant 2 : index
    %c0_83 = arith.constant 0 : index
    %c0_84 = arith.constant 0 : index
    %72 = vector.load %arg6[%c2_82, %c0_83, %c0_84] : memref<3x384x128xbf16, #tpu.memory_space<vmem>>, vector<1x384x128xbf16>
    %73 = vector.shape_cast %72 : vector<1x384x128xbf16> to vector<384x128xbf16>
    %cst_85 = arith.constant dense<0.000000e+00> : vector<128x128xf32>
    %74 = tpu.matmul %71, %73, %cst_85 {dimension_numbers = #tpu.dot_dimension_numbers<[1], [0], [0], [1], [0, 0, 1, 1], [], []>} : vector<128x384xbf16>, vector<384x128xbf16>, vector<128x128xf32> -> vector<128x128xf32>
    %75 = arith.addf %69, %74 : vector<128x128xf32>
    %c0_86 = arith.constant 0 : index
    %c0_87 = arith.constant 0 : index
    %76 = vector.load %arg7[%c0_86, %c0_87] : memref<1x128xf32, #tpu.memory_space<vmem>>, vector<1x128xf32>
    %77 = vector.broadcast %76 : vector<1x128xf32> to vector<128x128xf32>
    %78 = arith.addf %75, %77 : vector<128x128xf32>
    %cst_88 = arith.constant 0.000000e+00 : f32
    %79 = vector.broadcast %cst_88 : f32 to vector<128x128xf32>
    %80 = arith.maximumf %78, %79 : vector<128x128xf32>
    %81 = arith.truncf %80 : vector<128x128xf32> to vector<128x128xbf16>
    %c0_89 = arith.constant 0 : index
    %c0_90 = arith.constant 0 : index
    %82 = vector.load %arg8[%c0_89, %c0_90] : memref<128x128xbf16, #tpu.memory_space<vmem>>, vector<128x128xbf16>
    %cst_91 = arith.constant dense<0.000000e+00> : vector<128x128xf32>
    %83 = tpu.matmul %81, %82, %cst_91 {dimension_numbers = #tpu.dot_dimension_numbers<[1], [0], [0], [1], [0, 0, 1, 1], [], []>} : vector<128x128xbf16>, vector<128x128xbf16>, vector<128x128xf32> -> vector<128x128xf32>
    %c0_92 = arith.constant 0 : index
    %c0_93 = arith.constant 0 : index
    %84 = vector.load %arg9[%c0_92, %c0_93] : memref<1x128xf32, #tpu.memory_space<vmem>>, vector<1x128xf32>
    %85 = vector.broadcast %84 : vector<1x128xf32> to vector<128x128xf32>
    %86 = arith.addf %83, %85 : vector<128x128xf32>
    %c0_94 = arith.constant 0 : index
    %c0_95 = arith.constant 0 : index
    %c0_96 = arith.constant 0 : index
    %c0_97 = arith.constant 0 : index
    %87 = vector.load %arg2[%c0_94, %c0_95, %c0_96, %c0_97] : memref<1x8x16x128xbf16, #tpu.memory_space<vmem>>, vector<1x8x16x128xbf16>
    %88 = vector.shape_cast %87 : vector<1x8x16x128xbf16> to vector<8x16x128xbf16>
    %89 = vector.shape_cast %88 : vector<8x16x128xbf16> to vector<128x128xbf16>
    %90 = arith.extf %89 : vector<128x128xbf16> to vector<128x128xf32>
    %91 = arith.addf %86, %90 : vector<128x128xf32>
    %cst_98 = arith.constant 0.000000e+00 : f32
    %92 = vector.broadcast %cst_98 : f32 to vector<128x128xf32>
    %93 = arith.maximumf %91, %92 : vector<128x128xf32>
    %94 = vector.shape_cast %93 : vector<128x128xf32> to vector<8x16x128xf32>
    %c0_99 = arith.constant 0 : index
    %c0_100 = arith.constant 0 : index
    %c0_101 = arith.constant 0 : index
    %c0_102 = arith.constant 0 : index
    %95 = vector.load %arg10[%c0_99, %c0_100, %c0_101, %c0_102] : memref<1x8x16x128xf32, #tpu.memory_space<vmem>>, vector<1x8x16x128xf32>
    %96 = vector.shape_cast %95 : vector<1x8x16x128xf32> to vector<8x16x128xf32>
    %97 = vector.shape_cast %94 : vector<8x16x128xf32> to vector<1x8x16x128xf32>
    tpu.vector_store %arg10[%c0_99, %c0_100, %c0_101, %c0_102], %97 {strides = array<i32>} : memref<1x8x16x128xf32, #tpu.memory_space<vmem>>, vector<1x8x16x128xf32>,
    return
  }
  func.func @transform_0(%arg0: i32, %arg1: i32) -> (i32, i32, i32, i32) {
    %c0_i32 = arith.constant 0 : i32
    %c0_i32_0 = arith.constant 0 : i32
    %c0_i32_1 = arith.constant 0 : i32
    return %arg0, %arg1, %c0_i32, %c0_i32_0 : i32, i32, i32, i32
  }
  func.func @transform_1(%arg0: i32, %arg1: i32) -> (i32, i32, i32, i32) {
    %c0_i32 = arith.constant 0 : i32
    %c0_i32_0 = arith.constant 0 : i32
    %c0_i32_1 = arith.constant 0 : i32
    return %arg0, %arg1, %c0_i32, %c0_i32_0 : i32, i32, i32, i32
  }
  func.func @transform_2(%arg0: i32, %arg1: i32) -> (i32, i32) {
    %c0_i32 = arith.constant 0 : i32
    %c0_i32_0 = arith.constant 0 : i32
    %c0_i32_1 = arith.constant 0 : i32
    return %c0_i32, %c0_i32_0 : i32, i32
  }
  func.func @transform_3(%arg0: i32, %arg1: i32) -> (i32, i32) {
    %c0_i32 = arith.constant 0 : i32
    %c0_i32_0 = arith.constant 0 : i32
    %c0_i32_1 = arith.constant 0 : i32
    return %c0_i32, %c0_i32_0 : i32, i32
  }
  func.func @transform_4(%arg0: i32, %arg1: i32) -> (i32, i32, i32) {
    %c0_i32 = arith.constant 0 : i32
    %c0_i32_0 = arith.constant 0 : i32
    %c0_i32_1 = arith.constant 0 : i32
    %c0_i32_2 = arith.constant 0 : i32
    return %c0_i32, %c0_i32_0, %c0_i32_1 : i32, i32, i32
  }
  func.func @transform_5(%arg0: i32, %arg1: i32) -> (i32, i32) {
    %c0_i32 = arith.constant 0 : i32
    %c0_i32_0 = arith.constant 0 : i32
    %c0_i32_1 = arith.constant 0 : i32
    return %c0_i32, %c0_i32_0 : i32, i32
  }
  func.func @transform_6(%arg0: i32, %arg1: i32) -> (i32, i32) {
    %c0_i32 = arith.constant 0 : i32
    %c0_i32_0 = arith.constant 0 : i32
    %c0_i32_1 = arith.constant 0 : i32
    return %c0_i32, %c0_i32_0 : i32, i32
  }
  func.func @transform_7(%arg0: i32, %arg1: i32) -> (i32, i32) {
    %c0_i32 = arith.constant 0 : i32
    %c0_i32_0 = arith.constant 0 : i32
    %c0_i32_1 = arith.constant 0 : i32
    return %c0_i32, %c0_i32_0 : i32, i32
  }
  func.func @transform_8(%arg0: i32, %arg1: i32) -> (i32, i32, i32, i32) {
    %c0_i32 = arith.constant 0 : i32
    %c0_i32_0 = arith.constant 0 : i32
    %c0_i32_1 = arith.constant 0 : i32
    return %arg0, %arg1, %c0_i32, %c0_i32_0 : i32, i32, i32, i32
  }
}

</mosaic_0001>

<bundles_post_ra>
// kernel: tpu_custom_call.1
= control target key start
LH: loop header
LB: loop body
LE: loop exit
PB: predicated region body
PF: predicated region fallthrough
CT: control target
= control target key end

     0   :  { %s5150_s0 = inlined_call_operand.hbm [shape: bf16[2,16,16,128], index: 0, kind: input, shape index: {}]   ;;  %s5151_s1 = inlined_call_operand.hbm [shape: bf16[2,4,16,128], index: 1, kind: input, shape index: {}]   ;;  %s5152_s2 = inlined_call_operand.hbm [shape: bf16[128,128], index: 2, kind: input, shape index: {}]   ;;  %s5153_s3 = inlined_call_operand.vmem [shape: f32[1,128], index: 3, kind: input, shape index: {}]   ;;  %s5154_s4 = inlined_call_operand.hbm [shape: bf16[3,384,128], index: 4, kind: input, shape index: {}]   ;;  %s5155_s5 = inlined_call_operand.vmem [shape: f32[1,128], index: 5, kind: input, shape index: {}]   ;;  %s5156_s6 = inlined_call_operand.hbm [shape: bf16[128,128], index: 6, kind: input, shape index: {}]   ;;  %s5157_s7 = inlined_call_operand.vmem [shape: f32[1,128], index: 7, kind: input, shape index: {}]   ;;  %s5158_s8 = inlined_call_operand.hbm [shape: f32[2,16,16,128], index: 8, kind: output, shape index: {}]  }
   0x1   :  { %5173 = sst [smem:[#allocation27_spill]] %s5150_s0 }
   0x2   :  { %5174 = sst [smem:[#allocation28_spill]] %s5152_s2 }
   0x3   :  { %5175 = sst [smem:[#allocation29_spill]] %s5154_s4 }
   0x4   :  { %5176 = sst [smem:[#allocation30_spill]] %s5156_s6 }
   0x5   :  { %5177 = sst [smem:[#allocation31_spill]] %s5158_s8 }
   0x6   :  { %13 = vsyncpa [#allocation4], 0 }
   0x7   :  { %15 = vsyncpa [#allocation4 + $0x1], 0 }
   0x8   :  { %16 = vsyncpa [#allocation7], 0 }
   0x9   :  { %18 = vsyncpa [#allocation7 + $0x1], 0 }
   0xa   :  { %19 = vsyncpa [#allocation10], 0 }
   0xb   :  { %20 = vsyncpa [#allocation5], 0 }
   0xc   :  { %22 = vsyncpa [#allocation5 + $0x1], 0  ;;  %s4492_s27 = smov 0   ;;  %s4494_s28 = smov 0  }
   0xd   :  { %s4496_s29 = smov 0   ;;  %s4498_s30 = smov 0  }
   0xe   :  { %s4500_s9 = smov 0   ;;  %s4502_s10 = smov 0  }
   0xf   :  { %s4504_s11 = smov 0   ;;  %s4506_s12 = smov 0  }
  0x10 LB: > { %5178 = sst [smem:[#allocation18_spill]] %s4408_s27  ;;  %s4533_s13 = sadd.s32 4294967295, %s4436_s12   ;;  %s4436_s12 = sphi %s4506_s12, %s28_s12   ;;  %s4432_s11 = sphi %s4504_s11, %s5227_s11   ;;  %s4428_s10 = sphi %s4502_s10, %s5226_s10   ;;  %s4424_s9 = sphi %s4500_s9, %s5225_s9   ;;  %s4420_s30 = sphi %s4498_s30, %s5224_s30   ;;  %s4416_s29 = sphi %s4496_s29, %s5219_s29   ;;  %s4412_s28 = sphi %s4494_s28, %s5223_s28   ;;  %s4408_s27 = sphi %s4492_s27, %s5222_s27  }
  0x11   : > { %5179 = sst [smem:[#allocation19_spill]] %s4416_s29  ;;  %s3105_s14 = sadd.s32 4294967294, %s4436_s12  }
  0x12   : > { %5180 = sst [smem:[#allocation20_spill]] %s4424_s9  ;;  %p62_p0 = scmp.ne.s32.totalorder %s4412_s28, %s4408_s27 }
  0x13   : > { %5181 = sst [smem:[#allocation21_spill]] %s4436_s12  ;;  %p63_p1 = scmp.eq.s32.totalorder %s4533_s13, 0 }
  0x14   : > { %p248_p2 = scmp.eq.s32.totalorder %s3105_s14, 3  ;;  %p3106_p4 = scmp.ge.s32.totalorder %s4436_s12, 1 }
  0x15   : > { %p4541_p3 = por %p63_p1, %p62_p0  ;;  %p255_p6 = scmp.lt.s32.totalorder %s4436_s12, 5 }
  0x16   : > { %p4546_p5 = por %p248_p2, %p62_p0  ;;  %s5185_s2 = sld [smem:[#allocation28_spill]] }
  0x17   : > { %p4554_p7 = pnand %p3106_p4, %p255_p6  ;;  %s4438_s21 = smov [#allocation8]  }
  0x18   : > { %s5183_s16 = scalar_select %p4546_p5, 1, 0 }
  0x19   : > { %p4071_p8 = pneg %p4554_p7  ;;  %s268_s22 = sshll.u32 %s4438_s21, 4  ;;  %s269_s22 = int_to_ptr.vmem [resolvable:$true] %s268_s22 }
  0x1a   : > { %5184 = sst [smem:[#allocation22_spill]] %s5183_s16  ;;  %s5160_s14 = smov 64  }
  0x1b   : > { %p4562_p9 = pnand %p4071_p8, %p63_p1  ;;  %s5188_s4 = sld [smem:[#allocation29_spill]] }
  0x1c   : > { %s266_s19 = sshll.u32 %s5185_s2, 4  ;;  %s5162_s17 = smov 4   ;;  %s267_s19 = int_to_ptr.hbm [resolvable:$true] %s266_s19 }
  0x1d   : > { %4074 = dma.hbm_to_vmem [thread:$0]  (!%p4562_p9), %s267_s19, 1024, %s269_s22, [#allocation7], %s5160_s14, %s5160_s14, %s5162_s17  }
  0x1e   : > { %s4441_s18 = smov [#allocation9]   ;;  %s5189_s6 = sld [smem:[#allocation30_spill]] }
  0x1f   : > { %s285_s21 = sshll.u32 %s4441_s18, 4  ;;  %s37_s19 = sadd.s32 1, %s4428_s10  ;;  %s286_s21 = int_to_ptr.vmem [resolvable:$true] %s285_s21 }
  0x20   : > { %p38_p10 = scmp.ge.s32.totalorder %s37_s19, 2  ;;  %s40_s22 = sadd.s32 1, %s4432_s11 }
  0x21   : > { %s283_s26 = sshll.u32 %s5188_s4, 4  ;;  %s4442_s4 = smov [#allocation11]   ;;  %s284_s26 = int_to_ptr.hbm [resolvable:$true] %s283_s26 }
  0x22   : > { %4077 = dma.hbm_to_vmem [thread:$0]  (!%p4562_p9), %s284_s26, 9216, %s286_s21, [#allocation10], %s5160_s14, %s5160_s14, %s5162_s17  }
  0x23   : > { %s302_s16 = sshll.u32 %s4442_s4, 4  ;;  %p242_p11 = scmp.eq.s32.totalorder %s4533_s13, 3  ;;  %s303_s16 = int_to_ptr.vmem [resolvable:$true] %s302_s16 }
  0x24   : > { %s300_s2 = sshll.u32 %s5189_s6, 4  ;;  %p56_p12 = scmp.ne.s32.totalorder %s4416_s29, %s4412_s28  ;;  %s301_s2 = int_to_ptr.hbm [resolvable:$true] %s300_s2 }
  0x25   : > { %4080 = dma.hbm_to_vmem [thread:$0]  (!%p4562_p9), %s301_s2, 1024, %s303_s16, [#allocation10], %s5160_s14, %s5160_s14, %s5162_s17  }
  0x26   : > { %s5229_s19 = smov (%p38_p10, %s37_s19), 0  ;;  %s5231_s22 = smov (!%p38_p10, %s40_s22), %s4432_s11 }
  0x27   : > { %5190 = sst [smem:[#allocation23_spill]] %s5229_s19  ;;  %s49_s4 = sadd.s32 1, %s4416_s29 }
  0x28   : > { %p57_p13 = scmp.eq.s32.totalorder %s4436_s12, 0  ;;  %p42_p0 = scmp.ge.s32.totalorder %s5231_s22, 2 }
  0x29   : > { %p4597_p2 = por %p242_p11, %p56_p12  ;;  %s45_s2 = ssub.s32 %s4428_s10, %s5229_s19 }
  0x2a   : > { %p4603_p4 = por %p57_p13, %p56_p12  ;;  %s5233_s22 = smov (%p42_p0, %s5231_s22), 0 }
  0x2b   : > { %s5191_s23 = scalar_select %p4597_p2, 1, 0 }
  0x2c   : > { %5194 = sst [smem:[#allocation25_spill]] %s5233_s22  ;;  %p4095_p6 = scmp.lt.s32.totalorder %s4436_s12, 4 }
  0x2d   : > { %5192 = sst [smem:[#allocation24_spill]] %s5191_s23  ;;  %s319_s26 = sand.u32 1, %s4416_s29  }
  0x2e   : > { %s44_s18 = ssub.s32 %s4432_s11, %s5233_s22  ;;  %s3817_s21 = sshll.u32 %s4428_s10, 4 }
  0x2f   : > { %s46_s24 = sor.u32 %s45_s2, %s44_s18  ;;  %s3111_s25 = sshll.u32 %s319_s26, 6 }
  0x30   : > { %p47_p8 = scmp.eq.s32.totalorder %s46_s24, 0  ;;  %s3114_s14 = sshll.u32 %s4432_s11, 5 }
  0x31   : > { %s323_s17 = scalar_lea.vmem [#allocation3], %s3111_s25  ;;  %s329_s27 = sadd.s32 %s3817_s21, %s3114_s14 }
  0x32   : > { %s334_s6 = sshll.u32 %s323_s17, 4  ;;  %s3115_s23 = sshll.u32 %s329_s27, 2  ;;  %s335_s6 = int_to_ptr.vmem [resolvable:$true] %s334_s6 }
  0x33   : > { %s4616_s19 = scalar_select %p47_p8, %s4416_s29, %s49_s4  }
  0x34   : > { %p4622_p9 = pnand %p4095_p6, %p4603_p4  ;;  %s5197_s0 = sld [smem:[#allocation27_spill]] }
  0x35   : > { %5195 = sst [smem:[#allocation26_spill]] %s4616_s19  ;;  %s344_s17 = sand.u32 1, %s4436_s12  }
  0x36   : > { %s320_s4 = scalar_lea.sflag [#allocation4], %s319_s26  ;;  %s5198_s14 = smov 4  }
  0x37   : > { %s5199_s27 = smov 64   ;;  %s3116_s16 = sshll.u32 %s319_s26, 4 }
  0x38   : > { %s3818_s21 = sshll.u32 %s4428_s10, 2  ;;  %s3119_s24 = sshll.u32 %s4432_s11, 3 }
  0x39   : > { %s354_s25 = sadd.s32 %s3818_s21, %s3119_s24  ;;  %s348_s19 = scalar_lea.vmem [#allocation6], %s3116_s16 }
  0x3a   : > { %s331_s2 = scalar_lea.hbm %s5197_s0, %s3115_s23  ;;  %s359_s29 = sshll.u32 %s348_s19, 4  ;;  %s360_s29 = int_to_ptr.vmem [resolvable:$true] %s359_s29 }
  0x3b   : > { %s332_s18 = sshll.u32 %s331_s2, 4  ;;  %s3120_s9 = sshll.u32 %s354_s25, 2  ;;  %s333_s18 = int_to_ptr.hbm [resolvable:$true] %s332_s18 }
  0x3c   : > { %4084 = dma.hbm_to_vmem [thread:$0]  (!%p4622_p9), %s333_s18, 1024, %s335_s6, %s320_s4, %s5199_s27, %s5199_s27, %s5198_s14  }
  0x3d   : > { %s356_s2 = scalar_lea.hbm %s5151_s1, %s3120_s9  ;;  %s345_s12 = scalar_lea.sflag [#allocation7], %s344_s17 }
  0x3e   : > { %s357_s0 = sshll.u32 %s356_s2, 4  ;;  %371 = sbr.rel (%p4554_p7) target bundleno = 1079 (0x437), region = 52  ;;  %s358_s0 = int_to_ptr.hbm [resolvable:$true] %s357_s0 }
  0x3f   : > { %4087 = dma.hbm_to_vmem [thread:$0]  (!%p4622_p9), %s358_s0, 256, %s360_s29, %s345_s12, %s5199_s27, %s5199_s27, %s5198_s14  }
  0x40   : > { %s4648_s6 = sand.u32 (!%p4554_p7), 1, %s4412_s28  }
  0x41   : > { %s3122_s19 = sshll.u32 (!%p4554_p7), %s4648_s6, 6  ;;  %s374_s26 = scalar_lea.sflag (!%p4554_p7), [#allocation4], %s4648_s6 }
  0x42   : > { %s4652_s18 = scalar_lea.vmem (!%p4554_p7), [#allocation3], %s3122_s19 }
  0x43   : > { %4387 = dma.done.wait (%p4541_p3), %s374_s26, 1024  }
  0x44   : > { %4389 = vsyncadd (%p4541_p3), %s374_s26, 4294966272  ;;  %s383_s0 = sand.u32 1, %s4533_s13   ;;  %s3123_s8 = sshll.u32 %s4648_s6, 4 }
  0x45   : > { %s384_s29 = scalar_lea.sflag [#allocation7], %s383_s0  ;;  %s4660_s12 = scalar_lea.vmem [#allocation6], %s3123_s8 }
  0x46   : > { %4391 = dma.done.wait (%p4541_p3), %s384_s29, 256  }
  0x47   : > { %4393 = vsyncadd (%p4541_p3), %s384_s29, 4294967040 }
  0x48   : > { %4395 = dma.done.wait (%p63_p1), [#allocation7], 1024  }
  0x49   : > { %4397 = vsyncadd (%p63_p1), [#allocation7], 4294966272 }
  0x4a   : > { %4399 = dma.done.wait (%p63_p1), [#allocation10], 10240  }
  0x4b   : > { %4401 = vsyncadd (%p63_p1), [#allocation10], 4294957056  ;;  %s3127_s20 = sshll.u32 %s4648_s6, 7  ;;  %v3834_v0 = vld [vmem:[#allocation8 + $0x38] sm:$0xff]  ;;  %v3833_v1 = vld [vmem:[#allocation8 + $0x30] sm:$0xff]  ;;  %vm865_vm0 = vcmask 1043456  }
  0x4c   : > { %577 = vmatpush.bf16.msra.mxu0 %v3834_v0  ;;  %674 = vmatpush.bf16.msra.mxu1 %v3834_v0  ;;  %v3832_v2 = vld [vmem:[#allocation8 + $0x28] sm:$0xff]  ;;  %v3831_v3 = vld [vmem:[#allocation8 + $0x20] sm:$0xff]  ;;  %v3830_v4 = vld [vmem:[#allocation8 + $0x18] sm:$0xff]  ;;  %vm866_vm1 = vsmask.f32 7938  ;;  %vm900_vm7 = vcmask 1040384  }
  0x4d   : > { %v3829_v5 = vld [vmem:[#allocation8 + $0x10] sm:$0xff]  ;;  %v3828_v6 = vld [vmem:[#allocation8 + $0x8] sm:$0xff]  ;;  %v3827_v7 = vld [vmem:[#allocation8] sm:$0xff]  ;;  %vm926_vm3 = vsmask.f32 3328  ;;  %vm1050_vm12 = vcmask 1043459  }
  0x4e   : > { %v3819_v8 = vld [vmem:[%s4652_s18] sm:$0xff]  ;;  %v3820_v9 = vld [vmem:[%s4652_s18 + $0x8] sm:$0xff]  ;;  %v3821_v10 = vld [vmem:[%s4652_s18 + $0x10] sm:$0xff]  ;;  %vm927_vm4 = vsmask.f32 7440  ;;  %s4862_s17 = scalar_lea.vmem [#allocation12], %s3127_s20 }
  0x4f   : > { %v3822_v11 = vld [vmem:[%s4652_s18 + $0x18] sm:$0xff]  ;;  %v3835_v12 = vld [vmem:[%s4660_s12] sm:$0xff]  ;;  %v3824_v15 = vld [vmem:[%s4652_s18 + $0x28] sm:$0xff]  ;;  %vm718_vm5 = vsmask.f32 256  ;;  %p3200_p1 = scmp.ne.s32.totalorder %s4420_s30, 0 }
  0x50   : > { %578 = vmatpush.bf16.msra.mxu0 %v3833_v1  ;;  %675 = vmatpush.bf16.msra.mxu1 %v3833_v1  ;;  %v3823_v13 = vld [vmem:[%s4652_s18 + $0x20] sm:$0xff]  ;;  %v3836_v14 = vld [vmem:[%s4660_s12 + $0x8] sm:$0xff]  ;;  %v3825_v16 = vld [vmem:[%s4652_s18 + $0x30] sm:$0xff]  ;;  %vm719_vm6 = vsmask.f32 4368 }
  0x51   : > { %v3826_v17 = vld [vmem:[%s4652_s18 + $0x38] sm:$0xff]  ;;  %v4688_v18 = vld [vmem:[%s5153_s3] ss:$0 sm:$0xff]  ;;  %vm4693_vm2 = vmand %vm865_vm0, %vm866_vm1  ;;  %vm1051_vm13 = vsmask.f32 7950 }
  0x52   : > { %v868_v31 = vld [vmem:[#allocation2 + $0x18] sm:$0xf]  ;;  %vm4700_vm8 = vmor %vm926_vm3, %vm927_vm4  ;;  %v1019_v54 = vld [vmem:[#allocation2 + $0x2c] sm:$0xf] }
  0x53   : > { %vm4706_vm9 = vmor %vm718_vm5, %vm719_vm6 }
  0x54   : > { %579 = vmatpush.bf16.msra.mxu0 %v3832_v2  ;;  %676 = vmatpush.bf16.msra.mxu1 %v3832_v2  ;;  %vm4711_vm10 = vmand %vm900_vm7, %vm718_vm5 }
  0x55   : > { %vm4719_vm11 = vmand %vm865_vm0, %vm926_vm3 }
  0x56   : > { %vm4730_vm14 = vmand %vm1050_vm12, %vm1051_vm13 }
  0x58   : > { %580 = vmatpush.bf16.msra.mxu0 %v3831_v3  ;;  %677 = vmatpush.bf16.msra.mxu1 %v3831_v3 }
  0x5c   : > { %581 = vmatpush.bf16.msra.mxu0 %v3830_v4  ;;  %678 = vmatpush.bf16.msra.mxu1 %v3830_v4  ;;  %v872_v4 = vld [vmem:[#allocation2 + $0x30] sm:$0xf] }
  0x60   : > { %582 = vmatpush.bf16.msra.mxu0 %v3829_v5  ;;  %679 = vmatpush.bf16.msra.mxu1 %v3829_v5 }
  0x64   : > { %583 = vmatpush.bf16.msra.mxu0 %v3828_v6  ;;  %680 = vmatpush.bf16.msra.mxu1 %v3828_v6 }
  0x68   : > { %584 = vmatpush.bf16.msra.mxu0 %v3827_v7  ;;  %681 = vmatpush.bf16.msra.mxu1 %v3827_v7 }
  0x6b   : > { %585 = vmatmul.bf16.vlgmr.msra.gmra.mxu0 %v3819_v8  ;;  %682 = vmatmul.bf16.vlgmr.msra.gmra.mxu1 %v3835_v12 }
  0x7b   : > { %590 = vmatmul.bf16.gmra.mxu0 %v3820_v9  ;;  %687 = vmatmul.bf16.gmra.mxu1 %v3836_v14 }
  0x8b   : > { %595 = vmatmul.bf16.gmra.mxu0 %v3821_v10 }
  0x9b   : > { %600 = vmatmul.bf16.gmra.mxu0 %v3822_v11 }
  0xab   : > { %605 = vmatmul.bf16.gmra.mxu0 %v3823_v13 }
  0xbb   : > { %610 = vmatmul.bf16.gmra.mxu0 %v3824_v15 }
  0xcb   : > { %615 = vmatmul.bf16.gmra.mxu0 %v3825_v16 }
  0xdb   : > { %620 = vmatmul.bf16.gmra.mxu0 %v3826_v17 }
  0xe8   : > { %v586_v19 = vpop.f32.mrf.mxu0 }
  0xe9   : > { %v587_v20 = vadd.f32 %v4688_v18, %v586_v19 }
  0xeb   : > { %v626_v21 = vmax.f32 %v587_v20, 0.0 }
  0xed   : > { %v642_v22 = vpack.c.bf16 %v626_v21, %v626_v21 }
  0xef   : > { %702 = vst [vmem:[#allocation2 + $0x1c] sm:$0xf] %v642_v22  ;;  %v722_v23 = vshrl.u32 %v642_v22, 16  ;;  %v725_v24 = vshll.u32 %v642_v22, 16 }
  0xf0   : > { %v588_v25 = vpop.f32.mrf.mxu0 }
  0xf1   : > { %v724_v26 = vrot.slane %v722_v23, 7  ;;  %v929_v27 = vrot.slane %v722_v23, 4  ;;  %v930_v28 = vrot.slane %v725_v24, 5  ;;  %v589_v29 = vadd.f32 %v4688_v18, %v588_v25 }
  0xf3   : > { %v727_v32 = vor.u32 %v725_v24, %v724_v26  ;;  %v627_v33 = vmax.f32 %v589_v29, 0.0  ;;  %v931_v34 = vor.u32 %v930_v28, %v929_v27  ;;  %v728_v46 = vrot.slane %v724_v26, 4  ;;  %v1023_v27 = vld [vmem:[#allocation2 + $0x44] sm:$0xf] }
  0xf5   : > { %v869_v35 = vsel %vm4693_vm2, %v727_v32, %v868_v31  ;;  %v643_v36 = vpack.c.bf16 %v627_v33, %v627_v33  ;;  %v932_v39 = vrot.slane %v931_v34, 4 }
  0xf6   : > { %870 = vst [vmem:[#allocation2 + $0x18] sm:$0xf] %v869_v35 }
  0xf7   : > { %703 = vst [vmem:[#allocation2 + $0x28] sm:$0xf] %v643_v36  ;;  %v730_v37 = vshrl.u32 %v643_v36, 16  ;;  %v733_v38 = vshll.u32 %v643_v36, 16 }
  0xf8   : > { %v591_v41 = vpop.f32.mrf.mxu0 }
  0xf9   : > { %v732_v42 = vrot.slane %v730_v37, 7  ;;  %v933_v43 = vrot.slane %v733_v38, 5  ;;  %v935_v44 = vrot.slane %v730_v37, 4  ;;  %v592_v45 = vadd.f32 %v4688_v18, %v591_v41 }
  0xfb   : > { %v735_v49 = vor.u32 %v733_v38, %v732_v42  ;;  %v934_v50 = vsel %vm4700_vm8, %v932_v39, %v933_v43  ;;  %v936_v51 = vor.u32 %v935_v44, %v933_v43  ;;  %v628_v52 = vmax.f32 %v592_v45, 0.0  ;;  %v876_v43 = vld [vmem:[#allocation2 + $0x48] sm:$0xf] }
  0xfc   : > { %1017 = vst [vmem:[#allocation2 + $0x20] sm:$0xf] %v934_v50 }
  0xfd   : > { %v902_v55 = vld [vmem:[#allocation2 + $0x18] sm:$0x1]  ;;  %v736_v56 = vsel %vm4706_vm9, %v728_v46, %v735_v49  ;;  %v937_v57 = vrot.slane %v936_v51, 4  ;;  %v644_v58 = vpack.c.bf16 %v628_v52, %v628_v52 }
  0xfe   : > { %v903_v59 = vsel %vm4711_vm10, 0, %v902_v55  ;;  %871 = vst [vmem:[#allocation2 + $0x24] sm:$0xf] %v736_v56 }
  0xff   : > { %904 = vst [vmem:[#allocation2 + $0x18] sm:$0x1] %v903_v59  ;;  %v1020_v60 = vsel %vm4719_vm11, %v937_v57, %v1019_v54  ;;  %v738_v61 = vshrl.u32 %v644_v58, 16  ;;  %v741_v62 = vshll.u32 %v644_v58, 16 }
 0x100   : > { %1021 = vst [vmem:[#allocation2 + $0x2c] sm:$0xf] %v1020_v60  ;;  %v593_v63 = vpop.f32.mrf.mxu0 }
 0x101   : > { %704 = vst [vmem:[#allocation2 + $0x34] sm:$0xf] %v644_v58  ;;  %v740_v0 = vrot.slane %v738_v61, 7  ;;  %v938_v1 = vrot.slane %v738_v61, 4  ;;  %v939_v2 = vrot.slane %v741_v62, 5  ;;  %v594_v3 = vadd.f32 %v4688_v18, %v593_v63 }
 0x103   : > { %v743_v5 = vor.u32 %v741_v62, %v740_v0  ;;  %v629_v6 = vmax.f32 %v594_v3, 0.0  ;;  %v940_v7 = vor.u32 %v939_v2, %v938_v1  ;;  %v744_v22 = vrot.slane %v740_v0, 4  ;;  %v1027_v3 = vld [vmem:[#allocation2 + $0x5c] sm:$0xf] }
 0x105   : > { %v873_v9 = vsel %vm4693_vm2, %v743_v5, %v872_v4  ;;  %v645_v10 = vpack.c.bf16 %v629_v6, %v629_v6  ;;  %v941_v15 = vrot.slane %v940_v7, 4 }
 0x106   : > { %874 = vst [vmem:[#allocation2 + $0x30] sm:$0xf] %v873_v9 }
 0x107   : > { %v1053_v11 = vld [vmem:[#allocation2 + $0x2c] sm:$0x8]  ;;  %705 = vst [vmem:[#allocation2 + $0x40] sm:$0xf] %v645_v10  ;;  %v746_v12 = vshrl.u32 %v645_v10, 16  ;;  %v749_v13 = vshll.u32 %v645_v10, 16 }
 0x108   : > { %v1054_v14 = vsel %vm4730_vm14, 0, %v1053_v11  ;;  %v596_v16 = vpop.f32.mrf.mxu0 }
 0x109   : > { %1055 = vst [vmem:[#allocation2 + $0x2c] sm:$0x8] %v1054_v14  ;;  %v748_v17 = vrot.slane %v746_v12, 7  ;;  %v942_v19 = vrot.slane %v749_v13, 5  ;;  %v944_v20 = vrot.slane %v746_v12, 4  ;;  %v597_v21 = vadd.f32 %v4688_v18, %v596_v16  ;;  %v683_v14 = vpop.f32.mrf.mxu1 }
 0x10b   : > { %v751_v23 = vor.u32 %v749_v13, %v748_v17  ;;  %v943_v24 = vsel %vm4700_vm8, %v941_v15, %v942_v19  ;;  %v945_v25 = vor.u32 %v944_v20, %v942_v19  ;;  %v630_v26 = vmax.f32 %v597_v21, 0.0  ;;  %v880_v20 = vld [vmem:[#allocation2 + $0x60] sm:$0xf] }
 0x10c   : > { %1022 = vst [vmem:[#allocation2 + $0x38] sm:$0xf] %v943_v24 }
 0x10d   : > { %v905_v28 = vld [vmem:[#allocation2 + $0x30] sm:$0x1]  ;;  %v752_v29 = vsel %vm4706_vm9, %v744_v22, %v751_v23  ;;  %v946_v31 = vrot.slane %v945_v25, 4  ;;  %v646_v32 = vpack.c.bf16 %v630_v26, %v630_v26 }
 0x10e   : > { %v906_v33 = vsel %vm4711_vm10, 0, %v905_v28  ;;  %875 = vst [vmem:[#allocation2 + $0x3c] sm:$0xf] %v752_v29  ;;  %v684_v29 = vadd.f32 %v4688_v18, %v683_v14 }
 0x10f   : > { %907 = vst [vmem:[#allocation2 + $0x30] sm:$0x1] %v906_v33  ;;  %v1024_v34 = vsel %vm4719_vm11, %v946_v31, %v1023_v27  ;;  %v754_v35 = vshrl.u32 %v646_v32, 16  ;;  %v757_v36 = vshll.u32 %v646_v32, 16 }
 0x110   : > { %1025 = vst [vmem:[#allocation2 + $0x44] sm:$0xf] %v1024_v34  ;;  %v598_v37 = vpop.f32.mrf.mxu0 }
 0x111   : > { %706 = vst [vmem:[#allocation2 + $0x4c] sm:$0xf] %v646_v32  ;;  %v756_v38 = vrot.slane %v754_v35, 7  ;;  %v947_v39 = vrot.slane %v754_v35, 4  ;;  %v948_v41 = vrot.slane %v757_v36, 5  ;;  %v599_v42 = vadd.f32 %v4688_v18, %v598_v37  ;;  %v685_v34 = vpop.f32.mrf.mxu1 }
 0x113   : > { %v759_v44 = vor.u32 %v757_v36, %v756_v38  ;;  %v631_v45 = vmax.f32 %v599_v42, 0.0  ;;  %v949_v46 = vor.u32 %v948_v41, %v947_v39  ;;  %v760_v62 = vrot.slane %v756_v38, 4 }
 0x114   : > { %v693_v41 = vmax.f32 %v684_v29, 0.0  ;;  %v686_v42 = vadd.f32 %v4688_v18, %v685_v34 }
 0x115   : > { %v877_v49 = vsel %vm4693_vm2, %v759_v44, %v876_v43  ;;  %v647_v50 = vpack.c.bf16 %v631_v45, %v631_v45  ;;  %v950_v56 = vrot.slane %v949_v46, 4 }
 0x116   : > { %878 = vst [vmem:[#allocation2 + $0x48] sm:$0xf] %v877_v49  ;;  %v1031_v49 = vld [vmem:[#allocation2 + $0x74] sm:$0xf] }
 0x117   : > { %v1056_v51 = vld [vmem:[#allocation2 + $0x44] sm:$0x8]  ;;  %707 = vst [vmem:[#allocation2 + $0x58] sm:$0xf] %v647_v50  ;;  %v762_v52 = vshrl.u32 %v647_v50, 16  ;;  %v765_v54 = vshll.u32 %v647_v50, 16  ;;  %v697_v50 = vpack.c.bf16 %v693_v41, %v693_v41 }
 0x118   : > { %v1057_v55 = vsel %vm4730_vm14, 0, %v1056_v51  ;;  %v601_v57 = vpop.f32.mrf.mxu0  ;;  %v694_v51 = vmax.f32 %v686_v42, 0.0  ;;  %v1116_v41 = vld [vmem:[#allocation2 + $0x14] sm:$0xf] }
 0x119   : > { %1058 = vst [vmem:[#allocation2 + $0x44] sm:$0x8] %v1057_v55  ;;  %v764_v58 = vrot.slane %v762_v52, 7  ;;  %v951_v59 = vrot.slane %v765_v54, 5  ;;  %v953_v60 = vrot.slane %v762_v52, 4  ;;  %v602_v61 = vadd.f32 %v4688_v18, %v601_v57 }
 0x11a   : > { %1077 = vst [vmem:[#allocation2 + $0x4] sm:$0xf] %v697_v50 }
 0x11b   : > { %v767_v63 = vor.u32 %v765_v54, %v764_v58  ;;  %v952_v0 = vsel %vm4700_vm8, %v950_v56, %v951_v59  ;;  %v954_v1 = vor.u32 %v953_v60, %v951_v59  ;;  %v632_v2 = vmax.f32 %v602_v61, 0.0 }
 0x11c   : > { %1026 = vst [vmem:[#allocation2 + $0x50] sm:$0xf] %v952_v0  ;;  %v1080_v58 = vshrl.u32 %v697_v50, 16  ;;  %v1083_v59 = vshll.u32 %v697_v50, 16  ;;  %v698_v60 = vpack.c.bf16 %v694_v51, %v694_v51  ;;  %v1097_v0 = vld [vmem:[#allocation2] sm:$0xf] }
 0x11d   : > { %v908_v4 = vld [vmem:[#allocation2 + $0x48] sm:$0x1]  ;;  %v768_v5 = vsel %vm4706_vm9, %v760_v62, %v767_v63  ;;  %v955_v6 = vrot.slane %v954_v1, 4  ;;  %v648_v7 = vpack.c.bf16 %v632_v2, %v632_v2 }
 0x11e   : > { %v909_v9 = vsel %vm4711_vm10, 0, %v908_v4  ;;  %879 = vst [vmem:[#allocation2 + $0x54] sm:$0xf] %v768_v5  ;;  %v1082_v2 = vrot.slane %v1080_v58, 7  ;;  %v1105_v4 = vrot.slane %v1083_v59, 5  ;;  %v1088_v5 = vshrl.u32 %v698_v60, 16 }
 0x11f   : > { %910 = vst [vmem:[#allocation2 + $0x48] sm:$0x1] %v909_v9  ;;  %v1028_v10 = vsel %vm4719_vm11, %v955_v6, %v1027_v3  ;;  %v770_v11 = vshrl.u32 %v648_v7, 16  ;;  %v773_v12 = vshll.u32 %v648_v7, 16  ;;  %v1104_v3 = vrot.slane %v1080_v58, 4  ;;  %v688_v6 = vpop.f32.mrf.mxu1 }
 0x120   : > { %1029 = vst [vmem:[#allocation2 + $0x5c] sm:$0xf] %v1028_v10  ;;  %v603_v13 = vpop.f32.mrf.mxu0  ;;  %v689_v34 = vadd.f32 %v4688_v18, %v688_v6 }
 0x121   : > { %708 = vst [vmem:[#allocation2 + $0x64] sm:$0xf] %v648_v7  ;;  %v772_v15 = vrot.slane %v770_v11, 7  ;;  %v956_v16 = vrot.slane %v770_v11, 4  ;;  %v957_v17 = vrot.slane %v773_v12, 5  ;;  %v604_v19 = vadd.f32 %v4688_v18, %v603_v13 }
 0x122   : > { %v1085_v13 = vor.u32 %v1083_v59, %v1082_v2  ;;  %v1106_v14 = vor.u32 %v1105_v4, %v1104_v3  ;;  %1078 = vst [vmem:[#allocation2 + $0x10] sm:$0xf] %v698_v60  ;;  %v695_v51 = vmax.f32 %v689_v34, 0.0 }
 0x123   : > { %v775_v21 = vor.u32 %v773_v12, %v772_v15  ;;  %v633_v22 = vmax.f32 %v604_v19, 0.0  ;;  %v958_v23 = vor.u32 %v957_v17, %v956_v16  ;;  %v776_v39 = vrot.slane %v772_v15, 4  ;;  %v884_v12 = vld [vmem:[#allocation2 + $0x78] sm:$0xf] }
 0x124   : > { %v1090_v15 = vrot.slane %v1088_v5, 7 }
 0x125   : > { %v881_v24 = vsel %vm4693_vm2, %v775_v21, %v880_v20  ;;  %v649_v25 = vpack.c.bf16 %v633_v22, %v633_v22  ;;  %v959_v32 = vrot.slane %v958_v23, 4  ;;  %v1086_v20 = vrot.slane %v1082_v2, 4 }
 0x126   : > { %882 = vst [vmem:[#allocation2 + $0x60] sm:$0xf] %v881_v24  ;;  %v1098_v21 = vsel %vm4693_vm2, %v1085_v13, %v1097_v0  ;;  %v1107_v22 = vrot.slane %v1106_v14, 4  ;;  %v1091_v23 = vshll.u32 %v698_v60, 16  ;;  %v1110_v24 = vrot.slane %v1088_v5, 4 }
 0x127   : > { %v1059_v26 = vld [vmem:[#allocation2 + $0x5c] sm:$0x8]  ;;  %709 = vst [vmem:[#allocation2 + $0x70] sm:$0xf] %v649_v25  ;;  %v778_v27 = vshrl.u32 %v649_v25, 16  ;;  %v781_v28 = vshll.u32 %v649_v25, 16  ;;  %v690_v42 = vpop.f32.mrf.mxu1 }
 0x128   : > { %v1060_v31 = vsel %vm4730_vm14, 0, %v1059_v26  ;;  %v606_v33 = vpop.f32.mrf.mxu0  ;;  %1099 = vst [vmem:[#allocation2] sm:$0xf] %v1098_v21  ;;  %v1108_v29 = vrot.slane %v1091_v23, 5 }
 0x129   : > { %1061 = vst [vmem:[#allocation2 + $0x5c] sm:$0x8] %v1060_v31  ;;  %v780_v35 = vrot.slane %v778_v27, 7  ;;  %v960_v36 = vrot.slane %v781_v28, 5  ;;  %v962_v37 = vrot.slane %v778_v27, 4  ;;  %v607_v38 = vadd.f32 %v4688_v18, %v606_v33 }
 0x12b   : > { %v783_v43 = vor.u32 %v781_v28, %v780_v35  ;;  %v961_v44 = vsel %vm4700_vm8, %v959_v32, %v960_v36  ;;  %v963_v45 = vor.u32 %v962_v37, %v960_v36  ;;  %v634_v46 = vmax.f32 %v607_v38, 0.0 }
 0x12c   : > { %1030 = vst [vmem:[#allocation2 + $0x68] sm:$0xf] %v961_v44  ;;  %v1093_v28 = vor.u32 %v1091_v23, %v1090_v15  ;;  %v1109_v38 = vsel %vm4700_vm8, %v1107_v22, %v1108_v29  ;;  %v888_v23 = vld [vmem:[#allocation2 + $0x90] sm:$0xf] }
 0x12d   : > { %v911_v52 = vld [vmem:[#allocation2 + $0x60] sm:$0x1]  ;;  %v784_v54 = vsel %vm4706_vm9, %v776_v39, %v783_v43  ;;  %v964_v55 = vrot.slane %v963_v45, 4  ;;  %v650_v56 = vpack.c.bf16 %v634_v46, %v634_v46  ;;  %v1111_v39 = vor.u32 %v1110_v24, %v1108_v29  ;;  %1115 = vst [vmem:[#allocation2 + $0x8] sm:$0xf] %v1109_v38 }
 0x12e   : > { %v912_v57 = vsel %vm4711_vm10, 0, %v911_v52  ;;  %883 = vst [vmem:[#allocation2 + $0x6c] sm:$0xf] %v784_v54  ;;  %v1094_v37 = vsel %vm4706_vm9, %v1086_v20, %v1093_v28  ;;  %v691_v52 = vadd.f32 %v4688_v18, %v690_v42 }
 0x12f   : > { %913 = vst [vmem:[#allocation2 + $0x60] sm:$0x1] %v912_v57  ;;  %v1032_v61 = vsel %vm4719_vm11, %v964_v55, %v1031_v49  ;;  %v786_v62 = vshrl.u32 %v650_v56, 16  ;;  %v789_v63 = vshll.u32 %v650_v56, 16  ;;  %v1112_v50 = vrot.slane %v1111_v39, 4 }
 0x130   : > { %1033 = vst [vmem:[#allocation2 + $0x74] sm:$0xf] %v1032_v61  ;;  %v608_v1 = vpop.f32.mrf.mxu0  ;;  %v1035_v57 = vld [vmem:[#allocation2 + $0x8c] sm:$0xf]  ;;  %v1101_v59 = vld [vmem:[#allocation2] sm:$0x1]  ;;  %v699_v61 = vpack.c.bf16 %v695_v51, %v695_v51 }
 0x131   : > { %710 = vst [vmem:[#allocation2 + $0x7c] sm:$0xf] %v650_v56  ;;  %v788_v7 = vrot.slane %v786_v62, 7  ;;  %v965_v9 = vrot.slane %v786_v62, 4  ;;  %v966_v10 = vrot.slane %v789_v63, 5  ;;  %v609_v11 = vadd.f32 %v4688_v18, %v608_v1 }
 0x132   : > { %1100 = vst [vmem:[#allocation2 + $0xc] sm:$0xf] %v1094_v37  ;;  %v1117_v60 = vsel %vm4719_vm11, %v1112_v50, %v1116_v41  ;;  %v696_v62 = vmax.f32 %v691_v52, 0.0  ;;  %v1102_v3 = vsel %vm4711_vm10, 0, %v1101_v59  ;;  %v1126_v5 = vshrl.u32 %v699_v61, 16 }
 0x133   : > { %v791_v16 = vor.u32 %v789_v63, %v788_v7  ;;  %v967_v17 = vor.u32 %v966_v10, %v965_v9  ;;  %v635_v19 = vmax.f32 %v609_v11, 0.0  ;;  %v792_v49 = vrot.slane %v788_v7, 4  ;;  %1118 = vst [vmem:[#allocation2 + $0x14] sm:$0xf] %v1117_v60 }
 0x134   : > { %v1129_v6 = vshll.u32 %v699_v61, 16  ;;  %v700_v7 = vpack.c.bf16 %v696_v62, %v696_v62  ;;  %v1128_v14 = vrot.slane %v1126_v5, 7  ;;  %v1150_v15 = vrot.slane %v1126_v5, 4  ;;  %1103 = vst [vmem:[#allocation2] sm:$0x1] %v1102_v3 }
 0x135   : > { %v885_v25 = vsel %vm4693_vm2, %v791_v16, %v884_v12  ;;  %v651_v26 = vpack.c.bf16 %v635_v19, %v635_v19  ;;  %v968_v27 = vrot.slane %v967_v17, 4  ;;  %v1143_v12 = vld [vmem:[#allocation2 + $0xd8] sm:$0xf]  ;;  %1123 = vst [vmem:[#allocation2 + $0xdc] sm:$0xf] %v699_v61 }
 0x136   : > { %886 = vst [vmem:[#allocation2 + $0x78] sm:$0xf] %v885_v25  ;;  %v1151_v16 = vrot.slane %v1129_v6, 5  ;;  %v1134_v17 = vshrl.u32 %v700_v7, 16  ;;  %v1131_v24 = vor.u32 %v1129_v6, %v1128_v14 }
 0x137   : > { %v1062_v31 = vld [vmem:[#allocation2 + $0x74] sm:$0x8]  ;;  %711 = vst [vmem:[#allocation2 + $0x88] sm:$0xf] %v651_v26  ;;  %v794_v32 = vshrl.u32 %v651_v26, 16  ;;  %v797_v33 = vshll.u32 %v651_v26, 16 }
 0x138   : > { %v1063_v35 = vsel %vm4730_vm14, 0, %v1062_v31  ;;  %v611_v36 = vpop.f32.mrf.mxu0  ;;  %v1152_v25 = vor.u32 %v1151_v16, %v1150_v15  ;;  %v1136_v26 = vrot.slane %v1134_v17, 7  ;;  %v1132_v31 = vrot.slane %v1128_v14, 4  ;;  %1124 = vst [vmem:[#allocation2 + $0xe8] sm:$0xf] %v700_v7 }
 0x139   : > { %1064 = vst [vmem:[#allocation2 + $0x74] sm:$0x8] %v1063_v35  ;;  %v796_v43 = vrot.slane %v794_v32, 7  ;;  %v969_v44 = vrot.slane %v797_v33, 5  ;;  %v971_v45 = vrot.slane %v794_v32, 4  ;;  %v612_v46 = vadd.f32 %v4688_v18, %v611_v36 }
 0x13a   : > { %v1119_v32 = vld [vmem:[#allocation2 + $0x14] sm:$0x8]  ;;  %v1153_v34 = vrot.slane %v1152_v25, 4  ;;  %v1137_v35 = vshll.u32 %v700_v7, 16 }
 0x13b   : > { %v799_v54 = vor.u32 %v797_v33, %v796_v43  ;;  %v970_v55 = vsel %vm4700_vm8, %v968_v27, %v969_v44  ;;  %v972_v56 = vor.u32 %v971_v45, %v969_v44  ;;  %v636_v58 = vmax.f32 %v612_v46, 0.0 }
 0x13c   : > { %1034 = vst [vmem:[#allocation2 + $0x80] sm:$0xf] %v970_v55  ;;  %v1144_v33 = vsel %vm4693_vm2, %v1131_v24, %v1143_v12  ;;  %v1120_v38 = vsel %vm4730_vm14, 0, %v1119_v32  ;;  %v1139_v41 = vor.u32 %v1137_v35, %v1136_v26  ;;  %v1154_v42 = vrot.slane %v1137_v35, 5  ;;  %v1162_v55 = vld [vmem:[#allocation2 + $0xec] sm:$0xf] }
 0x13d   : > { %v914_v63 = vld [vmem:[#allocation2 + $0x78] sm:$0x1]  ;;  %v800_v0 = vsel %vm4706_vm9, %v792_v49, %v799_v54  ;;  %v973_v1 = vrot.slane %v972_v56, 4  ;;  %v652_v2 = vpack.c.bf16 %v636_v58, %v636_v58  ;;  %1145 = vst [vmem:[#allocation2 + $0xd8] sm:$0xf] %v1144_v33  ;;  %v1156_v43 = vrot.slane %v1134_v17, 4 }
 0x13e   : > { %v915_v4 = vsel %vm4711_vm10, 0, %v914_v63  ;;  %887 = vst [vmem:[#allocation2 + $0x84] sm:$0xf] %v800_v0  ;;  %v1140_v51 = vsel %vm4706_vm9, %v1132_v31, %v1139_v41  ;;  %v1155_v52 = vsel %vm4700_vm8, %v1153_v34, %v1154_v42 }
 0x13f   : > { %916 = vst [vmem:[#allocation2 + $0x78] sm:$0x1] %v915_v4  ;;  %v1036_v9 = vsel %vm4719_vm11, %v973_v1, %v1035_v57  ;;  %v802_v10 = vshrl.u32 %v652_v2, 16  ;;  %v805_v11 = vshll.u32 %v652_v2, 16  ;;  %v1157_v54 = vor.u32 %v1156_v43, %v1154_v42 }
 0x140   : > { %1037 = vst [vmem:[#allocation2 + $0x8c] sm:$0xf] %v1036_v9  ;;  %v613_v13 = vpop.f32.mrf.mxu0 }
 0x141   : > { %712 = vst [vmem:[#allocation2 + $0x94] sm:$0xf] %v652_v2  ;;  %v804_v19 = vrot.slane %v802_v10, 7  ;;  %v974_v20 = vrot.slane %v802_v10, 4  ;;  %v975_v21 = vrot.slane %v805_v11, 5  ;;  %v614_v22 = vadd.f32 %v4688_v18, %v613_v13 }
 0x142   : > { %1121 = vst [vmem:[#allocation2 + $0x14] sm:$0x8] %v1120_v38  ;;  %v1158_v61 = vrot.slane %v1157_v54, 4  ;;  %v1039_v2 = vld [vmem:[#allocation2 + $0xa4] sm:$0xf] }
 0x143   : > { %v807_v27 = vor.u32 %v805_v11, %v804_v19  ;;  %v976_v28 = vor.u32 %v975_v21, %v974_v20  ;;  %v637_v29 = vmax.f32 %v614_v22, 0.0  ;;  %v808_v60 = vrot.slane %v804_v19, 4  ;;  %1146 = vst [vmem:[#allocation2 + $0xe4] sm:$0xf] %v1140_v51  ;;  %v892_v21 = vld [vmem:[#allocation2 + $0xa8] sm:$0xf] }
 0x144   : > { %1161 = vst [vmem:[#allocation2 + $0xe0] sm:$0xf] %v1155_v52  ;;  %v1147_v3 = vld [vmem:[#allocation2 + $0xd8] sm:$0x1]  ;;  %v1163_v4 = vsel %vm4719_vm11, %v1158_v61, %v1162_v55 }
 0x145   : > { %v889_v36 = vsel %vm4693_vm2, %v807_v27, %v888_v23  ;;  %v653_v37 = vpack.c.bf16 %v637_v29, %v637_v29  ;;  %v977_v39 = vrot.slane %v976_v28, 4  ;;  %1164 = vst [vmem:[#allocation2 + $0xec] sm:$0xf] %v1163_v4  ;;  %v1148_v14 = vsel %vm4711_vm10, 0, %v1147_v3 }
 0x146   : > { %890 = vst [vmem:[#allocation2 + $0x90] sm:$0xf] %v889_v36 }
 0x147   : > { %v1065_v44 = vld [vmem:[#allocation2 + $0x8c] sm:$0x8]  ;;  %713 = vst [vmem:[#allocation2 + $0xa0] sm:$0xf] %v653_v37  ;;  %v810_v45 = vshrl.u32 %v653_v37, 16  ;;  %v813_v46 = vshll.u32 %v653_v37, 16 }
 0x148   : > { %v1066_v49 = vsel %vm4730_vm14, 0, %v1065_v44  ;;  %v616_v50 = vpop.f32.mrf.mxu0  ;;  %1149 = vst [vmem:[#allocation2 + $0xd8] sm:$0x1] %v1148_v14 }
 0x149   : > { %1067 = vst [vmem:[#allocation2 + $0x8c] sm:$0x8] %v1066_v49  ;;  %v812_v56 = vrot.slane %v810_v45, 7  ;;  %v978_v57 = vrot.slane %v813_v46, 5  ;;  %v980_v58 = vrot.slane %v810_v45, 4  ;;  %v617_v59 = vadd.f32 %v4688_v18, %v616_v50 }
 0x14b   : > { %v815_v62 = vor.u32 %v813_v46, %v812_v56  ;;  %v979_v63 = vsel %vm4700_vm8, %v977_v39, %v978_v57  ;;  %v981_v0 = vor.u32 %v980_v58, %v978_v57  ;;  %v638_v1 = vmax.f32 %v617_v59, 0.0  ;;  %v1043_v46 = vld [vmem:[#allocation2 + $0xbc] sm:$0xf] }
 0x14c   : > { %1038 = vst [vmem:[#allocation2 + $0x98] sm:$0xf] %v979_v63  ;;  %v1165_v25 = vld [vmem:[#allocation2 + $0xec] sm:$0x8]  ;;  %v896_v63 = vld [vmem:[#allocation2 + $0xc0] sm:$0xf] }
 0x14d   : > { %v917_v5 = vld [vmem:[#allocation2 + $0x90] sm:$0x1]  ;;  %v816_v6 = vsel %vm4706_vm9, %v808_v60, %v815_v62  ;;  %v982_v7 = vrot.slane %v981_v0, 4  ;;  %v654_v9 = vpack.c.bf16 %v638_v1, %v638_v1  ;;  %v1166_v28 = vsel %vm4730_vm14, 0, %v1165_v25 }
 0x14e   : > { %v918_v10 = vsel %vm4711_vm10, 0, %v917_v5  ;;  %891 = vst [vmem:[#allocation2 + $0x9c] sm:$0xf] %v816_v6 }
 0x14f   : > { %919 = vst [vmem:[#allocation2 + $0x90] sm:$0x1] %v918_v10  ;;  %v1040_v11 = vsel %vm4719_vm11, %v982_v7, %v1039_v2  ;;  %v818_v12 = vshrl.u32 %v654_v9, 16  ;;  %v821_v13 = vshll.u32 %v654_v9, 16 }
 0x150   : > { %1041 = vst [vmem:[#allocation2 + $0xa4] sm:$0xf] %v1040_v11  ;;  %v618_v15 = vpop.f32.mrf.mxu0 }
 0x151   : > { %714 = vst [vmem:[#allocation2 + $0xac] sm:$0xf] %v654_v9  ;;  %v820_v16 = vrot.slane %v818_v12, 7  ;;  %v983_v17 = vrot.slane %v818_v12, 4  ;;  %v984_v19 = vrot.slane %v821_v13, 5  ;;  %v619_v20 = vadd.f32 %v4688_v18, %v618_v15 }
 0x152   : > { %1167 = vst [vmem:[#allocation2 + $0xec] sm:$0x8] %v1166_v28 }
 0x153   : > { %v823_v22 = vor.u32 %v821_v13, %v820_v16  ;;  %v639_v23 = vmax.f32 %v619_v20, 0.0  ;;  %v985_v24 = vor.u32 %v984_v19, %v983_v17  ;;  %v824_v41 = vrot.slane %v820_v16, 4  ;;  %v1047_v16 = vld [vmem:[#allocation2 + $0xd4] sm:$0xf] }
 0x155   : > { %v893_v26 = vsel %vm4693_vm2, %v823_v22, %v892_v21  ;;  %v655_v27 = vpack.c.bf16 %v639_v23, %v639_v23  ;;  %v986_v34 = vrot.slane %v985_v24, 4 }
 0x156   : > { %894 = vst [vmem:[#allocation2 + $0xa8] sm:$0xf] %v893_v26 }
 0x157   : > { %v1068_v29 = vld [vmem:[#allocation2 + $0xa4] sm:$0x8]  ;;  %715 = vst [vmem:[#allocation2 + $0xb8] sm:$0xf] %v655_v27  ;;  %v826_v31 = vshrl.u32 %v655_v27, 16  ;;  %v829_v32 = vshll.u32 %v655_v27, 16 }
 0x158   : > { %v1069_v33 = vsel %vm4730_vm14, 0, %v1068_v29  ;;  %v621_v35 = vpop.f32.mrf.mxu0 }
 0x159   : > { %1070 = vst [vmem:[#allocation2 + $0xa4] sm:$0x8] %v1069_v33  ;;  %v828_v36 = vrot.slane %v826_v31, 7  ;;  %v987_v37 = vrot.slane %v829_v32, 5  ;;  %v989_v38 = vrot.slane %v826_v31, 4  ;;  %v622_v39 = vadd.f32 %v4688_v18, %v621_v35 }
 0x15b   : > { %v831_v42 = vor.u32 %v829_v32, %v828_v36  ;;  %v988_v43 = vsel %vm4700_vm8, %v986_v34, %v987_v37  ;;  %v990_v44 = vor.u32 %v989_v38, %v987_v37  ;;  %v640_v45 = vmax.f32 %v622_v39, 0.0 }
 0x15c   : > { %1042 = vst [vmem:[#allocation2 + $0xb0] sm:$0xf] %v988_v43 }
 0x15d   : > { %v920_v49 = vld [vmem:[#allocation2 + $0xa8] sm:$0x1]  ;;  %v832_v50 = vsel %vm4706_vm9, %v824_v41, %v831_v42  ;;  %v991_v51 = vrot.slane %v990_v44, 4  ;;  %v656_v52 = vpack.c.bf16 %v640_v45, %v640_v45 }
 0x15e   : > { %v921_v54 = vsel %vm4711_vm10, 0, %v920_v49  ;;  %895 = vst [vmem:[#allocation2 + $0xb4] sm:$0xf] %v832_v50 }
 0x15f   : > { %922 = vst [vmem:[#allocation2 + $0xa8] sm:$0x1] %v921_v54  ;;  %v1044_v55 = vsel %vm4719_vm11, %v991_v51, %v1043_v46  ;;  %v834_v56 = vshrl.u32 %v656_v52, 16  ;;  %v837_v57 = vshll.u32 %v656_v52, 16 }
 0x160   : > { %1045 = vst [vmem:[#allocation2 + $0xbc] sm:$0xf] %v1044_v55  ;;  %v623_v58 = vpop.f32.mrf.mxu0 }
 0x161   : > { %716 = vst [vmem:[#allocation2 + $0xc4] sm:$0xf] %v656_v52  ;;  %v836_v59 = vrot.slane %v834_v56, 7  ;;  %v992_v60 = vrot.slane %v834_v56, 4  ;;  %v993_v61 = vrot.slane %v837_v57, 5  ;;  %v624_v62 = vadd.f32 %v4688_v18, %v623_v58 }
 0x163   : > { %v839_v0 = vor.u32 %v837_v57, %v836_v59  ;;  %v641_v1 = vmax.f32 %v624_v62, 0.0  ;;  %v994_v3 = vor.u32 %v993_v61, %v992_v60  ;;  %v840_v13 = vrot.slane %v836_v59, 4 }
 0x165   : > { %v897_v2 = vsel %vm4693_vm2, %v839_v0, %v896_v63  ;;  %v657_v4 = vpack.c.bf16 %v641_v1, %v641_v1  ;;  %v995_v10 = vrot.slane %v994_v3, 4 }
 0x166   : > { %898 = vst [vmem:[#allocation2 + $0xc0] sm:$0xf] %v897_v2 }
 0x167   : > { %v1071_v5 = vld [vmem:[#allocation2 + $0xbc] sm:$0x8]  ;;  %717 = vst [vmem:[#allocation2 + $0xd0] sm:$0xf] %v657_v4  ;;  %v842_v6 = vshrl.u32 %v657_v4, 16  ;;  %v845_v7 = vshll.u32 %v657_v4, 16 }
 0x168   : > { %v1072_v9 = vsel %vm4730_vm14, 0, %v1071_v5 }
 0x169   : > { %1073 = vst [vmem:[#allocation2 + $0xbc] sm:$0x8] %v1072_v9  ;;  %v844_v11 = vrot.slane %v842_v6, 7  ;;  %v996_v18 = vrot.slane %v845_v7, 5  ;;  %v998_v12 = vrot.slane %v842_v6, 4 }
 0x16b   : > { %v847_v14 = vor.u32 %v845_v7, %v844_v11  ;;  %v997_v30 = vsel %vm4700_vm8, %v995_v10, %v996_v18  ;;  %v999_v15 = vor.u32 %v998_v12, %v996_v18 }
 0x16c   : > { %1046 = vst [vmem:[#allocation2 + $0xc8] sm:$0xf] %v997_v30 }
 0x16d   : > { %v923_v17 = vld [vmem:[#allocation2 + $0xc0] sm:$0x1]  ;;  %v848_v19 = vsel %vm4706_vm9, %v840_v13, %v847_v14  ;;  %v1000_v20 = vrot.slane %v999_v15, 4 }
 0x16e   : > { %v924_v21 = vsel %vm4711_vm10, 0, %v923_v17  ;;  %899 = vst [vmem:[#allocation2 + $0xcc] sm:$0xf] %v848_v19 }
 0x16f   : > { %925 = vst [vmem:[#allocation2 + $0xc0] sm:$0x1] %v924_v21  ;;  %v1048_v22 = vsel %vm4719_vm11, %v1000_v20, %v1047_v16 }
 0x170   : > { %1049 = vst [vmem:[#allocation2 + $0xd4] sm:$0xf] %v1048_v22 }
 0x175   : > { %1171 = sbr.rel (%p3200_p1) target bundleno = 383 (0x17f), region = 76 }
 0x177   : > { %v1074_v40 = vld [vmem:[#allocation2 + $0xd4] sm:$0x8] }
 0x178   : > { %v1075_v23 = vsel %vm4730_vm14, 0, %v1074_v40 }
 0x179   : > { %1076 = vst [vmem:[#allocation2 + $0xd4] sm:$0x8] %v1075_v23 }
 0x17a   : > { %v4443_v47 = vmov 0  }
 0x17b   : > { %1172 = vst [vmem:[#allocation2] sm:$0xff] %v4443_v47 }
 0x17c   : > { %1173 = vst [vmem:[#allocation2 + $0x8] sm:$0xf] %v4443_v47 }
 0x17d   : > { %1174 = vst [vmem:[#allocation2 + $0xc] sm:$0xff] %v4443_v47 }
 0x17e   : > { %1175 = vst [vmem:[#allocation2 + $0x14] sm:$0xf] %v4443_v47 }
 0x17f PF: > { %p3201_p3 = scmp.ne.s32.totalorder %s4420_s30, 1 }
 0x181   : > { %1179 = sbr.rel (%p3201_p3) target bundleno = 395 (0x18b), region = 80 }
 0x186   : > { %v4444_v48 = vmov 0  }
 0x187   : > { %1180 = vst [vmem:[#allocation2 + $0xd8] sm:$0xff] %v4444_v48 }
 0x188   : > { %1181 = vst [vmem:[#allocation2 + $0xe0] sm:$0xf] %v4444_v48 }
 0x189   : > { %1182 = vst [vmem:[#allocation2 + $0xe4] sm:$0xff] %v4444_v48 }
 0x18a   : > { %1183 = vst [vmem:[#allocation2 + $0xec] sm:$0xf] %v4444_v48 }
 0x18b PF: > { %v3916_v53 = vld [vmem:[#allocation9 + $0xf8] sm:$0xff]  ;;  %v3915_v25 = vld [vmem:[#allocation9 + $0xf0] sm:$0xff]  ;;  %v3914_v31 = vld [vmem:[#allocation9 + $0xe8] sm:$0xff]  ;;  %s5212_s21 = sld [smem:[#allocation20_spill]]  ;;  %s3989_s24 = sshll.u32 %s4420_s30, 4 }
 0x18c   : > { %v3924_v8 = vld [vmem:[#allocation9 + $0x138] sm:$0xff]  ;;  %1617 = vmatpush.bf16.msra.mxu2 %v3916_v53  ;;  %v3923_v26 = vld [vmem:[#allocation9 + $0x130] sm:$0xff]  ;;  %v3922_v32 = vld [vmem:[#allocation9 + $0x128] sm:$0xff]  ;;  %s5213_s19 = sld [smem:[#allocation31_spill]]  ;;  %s2957_s30 = sshll.u32 %s4862_s17, 4  ;;  %s2958_s30 = int_to_ptr.vmem [resolvable:$true] %s2957_s30 }
 0x18d   : > { %v3932_v24 = vld [vmem:[#allocation9 + $0x178] sm:$0xff]  ;;  %1666 = vmatpush.bf16.msra.mxu3 %v3924_v8  ;;  %v3931_v27 = vld [vmem:[#allocation9 + $0x170] sm:$0xff]  ;;  %v3930_v33 = vld [vmem:[#allocation9 + $0x168] sm:$0xff]  ;;  %s2942_s8 = scalar_lea.sflag [#allocation5], %s4648_s6 }
 0x18e   : > { %1715 = vmatpush.bf16.msrb.mxu1 %v3932_v24  ;;  %v3868_v28 = vld [vmem:[#allocation9 + $0x38] sm:$0xff]  ;;  %v3867_v29 = vld [vmem:[#allocation9 + $0x30] sm:$0xff]  ;;  %v3866_v34 = vld [vmem:[#allocation9 + $0x28] sm:$0xff] }
 0x18f   : > { %2036 = vmatpush.bf16.msrb.mxu0 %v3868_v28  ;;  %v3913_v35 = vld [vmem:[#allocation9 + $0xe0] sm:$0xff]  ;;  %v3912_v38 = vld [vmem:[#allocation9 + $0xd8] sm:$0xff]  ;;  %v3911_v44 = vld [vmem:[#allocation9 + $0xd0] sm:$0xff] }
 0x190   : > { %1618 = vmatpush.bf16.msra.mxu2 %v3915_v25  ;;  %v3921_v36 = vld [vmem:[#allocation9 + $0x120] sm:$0xff]  ;;  %v3920_v41 = vld [vmem:[#allocation9 + $0x118] sm:$0xff]  ;;  %v3919_v45 = vld [vmem:[#allocation9 + $0x110] sm:$0xff] }
 0x191   : > { %1667 = vmatpush.bf16.msra.mxu3 %v3923_v26  ;;  %v3929_v37 = vld [vmem:[#allocation9 + $0x160] sm:$0xff]  ;;  %v3928_v42 = vld [vmem:[#allocation9 + $0x158] sm:$0xff]  ;;  %v3927_v46 = vld [vmem:[#allocation9 + $0x150] sm:$0xff]  ;;  %s3813_s25 = sshll.u32 %s5212_s21, 5 }
 0x192   : > { %1716 = vmatpush.bf16.msrb.mxu1 %v3931_v27  ;;  %v3865_v39 = vld [vmem:[#allocation9 + $0x20] sm:$0xff]  ;;  %v3864_v43 = vld [vmem:[#allocation9 + $0x18] sm:$0xff]  ;;  %v3863_v49 = vld [vmem:[#allocation9 + $0x10] sm:$0xff]  ;;  %s2954_s9 = sadd.s32 %s3989_s24, %s3813_s25  ;;  %s4346_s15 = scalar_lea.hbm %s5213_s19, 512 }
 0x193   : > { %2037 = vmatpush.bf16.msrb.mxu0 %v3867_v29  ;;  %v3910_v50 = vld [vmem:[#allocation9 + $0xc8] sm:$0xff]  ;;  %v3909_v54 = vld [vmem:[#allocation9 + $0xc0] sm:$0xff]  ;;  %v3886_v59 = vld [vmem:[#allocation2 + $0x20] sm:$0xf0]  ;;  %s3814_s22 = sshll.u32 %s2954_s9, 3 }
 0x194   : > { %1619 = vmatpush.bf16.msra.mxu2 %v3914_v31  ;;  %v3918_v51 = vld [vmem:[#allocation9 + $0x108] sm:$0xff]  ;;  %v3917_v55 = vld [vmem:[#allocation9 + $0x100] sm:$0xff]  ;;  %v3206_v61 = vld [vmem:[#allocation2 + $0x24] sm:$0xf0]  ;;  %s2956_s26 = scalar_lea.hbm %s5213_s19, %s3814_s22 }
 0x195   : > { %1668 = vmatpush.bf16.msra.mxu3 %v3922_v32  ;;  %v3926_v52 = vld [vmem:[#allocation9 + $0x148] sm:$0xff]  ;;  %v3925_v56 = vld [vmem:[#allocation9 + $0x140] sm:$0xff]  ;;  %v3212_v62 = vld [vmem:[#allocation2 + $0x20] sm:$0xf]  ;;  %s2959_s0 = sshll.u32 %s2956_s26, 4  ;;  %s2960_s0 = int_to_ptr.hbm [resolvable:$true] %s2959_s0 }
 0x196   : > { %1717 = vmatpush.bf16.msrb.mxu1 %v3930_v33  ;;  %v3204_v57 = vld [vmem:[#allocation2 + $0x18] sm:$0xf]  ;;  %v3885_v60 = vld [vmem:[#allocation2 + $0x1c] sm:$0xf]  ;;  %v3887_v63 = vld [vmem:[#allocation2 + $0x28] sm:$0xf0] }
 0x197   : > { %2038 = vmatpush.bf16.msrb.mxu0 %v3866_v34  ;;  %v3862_v58 = vld [vmem:[#allocation9 + $0x8] sm:$0xff]  ;;  %v3876_v0 = vld [vmem:[#allocation9 + $0x78] sm:$0xff]  ;;  %v3205_v1 = vor.u32 %v3886_v59, %v3204_v57  ;;  %v3209_v2 = vor.u32 %v3885_v60, %v3206_v61  ;;  %v3213_v3 = vor.u32 %v3887_v63, %v3212_v62  ;;  %v3861_v4 = vld [vmem:[#allocation9] sm:$0xff]  ;;  %s4340_s29 = sshra.s32 %s2960_s0, 4  ;;  %s4341_s29 = int_to_ptr.hbm [resolvable:$true] %s4340_s29 }
 0x198   : > { %1620 = vmatpush.bf16.msra.mxu2 %v3913_v35  ;;  %v3396_v5 = vld [vmem:[#allocation2] sm:$0xf]  ;;  %v3838_v6 = vld [vmem:[#allocation2 + $0x8] sm:$0xf0]  ;;  %v3874_v10 = vld [vmem:[#allocation9 + $0x68] sm:$0xff]  ;;  %s4342_s12 = scalar_lea.hbm %s4341_s29, 128  ;;  %p4347_p12 = scmp.lt.s32.totalorder %s4341_s29, %s5213_s19 }
 0x199   : > { %1669 = vmatpush.bf16.msra.mxu3 %v3921_v36  ;;  %v3875_v7 = vld [vmem:[#allocation9 + $0x70] sm:$0xff]  ;;  %v3397_v9 = vor.u32 %v3838_v6, %v3396_v5  ;;  %v3216_v11 = vld [vmem:[#allocation2 + $0x30] sm:$0xf]  ;;  %v3889_v18 = vld [vmem:[#allocation2 + $0x38] sm:$0xf0]  ;;  %p4343_p7 = scmp.ne.s32.totalorder %s4341_s29, %s4342_s12  ;;  %p4348_p13 = scmp.lt.s32.totalorder %s4346_s15, %s4342_s12 }
 0x19a   : > { %1718 = vmatpush.bf16.msrb.mxu1 %v3929_v37  ;;  %v3888_v12 = vld [vmem:[#allocation2 + $0x34] sm:$0xf]  ;;  %v3218_v13 = vld [vmem:[#allocation2 + $0x3c] sm:$0xf0]  ;;  %v3224_v14 = vld [vmem:[#allocation2 + $0x38] sm:$0xf]  ;;  %v3217_v15 = vor.u32 %v3889_v18, %v3216_v11 }
 0x19b   : > { %2039 = vmatpush.bf16.msrb.mxu0 %v3865_v39  ;;  %v3890_v30 = vld [vmem:[#allocation2 + $0x40] sm:$0xf0]  ;;  %v3221_v16 = vor.u32 %v3888_v12, %v3218_v13  ;;  %v3408_v19 = vld [vmem:[#allocation2 + $0x18] sm:$0xf]  ;;  %v3873_v22 = vld [vmem:[#allocation9 + $0x60] sm:$0xff]  ;;  %p4344_p10 = pnand %p4343_p7, %p4597_p2  ;;  %p4349_p0 = por %p4348_p13, %p4347_p12 }
 0x19c   : > { %1621 = vmatpush.bf16.msra.mxu2 %v3912_v38  ;;  %v3225_v17 = vor.u32 %v3890_v30, %v3224_v14  ;;  %v3841_v20 = vld [vmem:[#allocation2 + $0x20] sm:$0xf0]  ;;  %v3228_v40 = vld [vmem:[#allocation2 + $0x48] sm:$0xf]  ;;  %v3892_v23 = vld [vmem:[#allocation2 + $0x50] sm:$0xf0] }
 0x19d   : > { %1670 = vmatpush.bf16.msra.mxu3 %v3920_v41  ;;  %v3409_v21 = vor.u32 %v3841_v20, %v3408_v19  ;;  %v3891_v47 = vld [vmem:[#allocation2 + $0x4c] sm:$0xf]  ;;  %v3230_v48 = vld [vmem:[#allocation2 + $0x54] sm:$0xf0]  ;;  %v3236_v53 = vld [vmem:[#allocation2 + $0x50] sm:$0xf]  ;;  %v3229_v24 = vor.u32 %v3892_v23, %v3228_v40  ;;  %p4345_p11 = pneg %p4344_p10 }
 0x19e   : > { %1719 = vmatpush.bf16.msrb.mxu1 %v3928_v42  ;;  %v3893_v8 = vld [vmem:[#allocation2 + $0x58] sm:$0xf0]  ;;  %v3233_v25 = vor.u32 %v3891_v47, %v3230_v48  ;;  %v3420_v27 = vld [vmem:[#allocation2 + $0x30] sm:$0xf]  ;;  %v3872_v31 = vld [vmem:[#allocation9 + $0x58] sm:$0xff] }
 0x19f   : > { %2040 = vmatpush.bf16.msrb.mxu0 %v3864_v43  ;;  %v3237_v26 = vor.u32 %v3893_v8, %v3236_v53  ;;  %v3844_v28 = vld [vmem:[#allocation2 + $0x38] sm:$0xf0]  ;;  %v3240_v32 = vld [vmem:[#allocation2 + $0x60] sm:$0xf]  ;;  %v3895_v33 = vld [vmem:[#allocation2 + $0x68] sm:$0xf0]  ;;  %p4350_p4 = pnand %p4349_p0, %p4345_p11 }
 0x1a0   : > { %1622 = vmatpush.bf16.msra.mxu2 %v3911_v44  ;;  %v3421_v29 = vor.u32 %v3844_v28, %v3420_v27  ;;  %v3894_v34 = vld [vmem:[#allocation2 + $0x64] sm:$0xf]  ;;  %v3242_v35 = vld [vmem:[#allocation2 + $0x6c] sm:$0xf0]  ;;  %v3248_v36 = vld [vmem:[#allocation2 + $0x68] sm:$0xf]  ;;  %v3241_v38 = vor.u32 %v3895_v33, %v3240_v32 }
 0x1a1   : > { %1671 = vmatpush.bf16.msra.mxu3 %v3919_v45  ;;  %v3896_v37 = vld [vmem:[#allocation2 + $0x70] sm:$0xf0]  ;;  %v3245_v39 = vor.u32 %v3894_v34, %v3242_v35  ;;  %v3432_v42 = vld [vmem:[#allocation2 + $0x48] sm:$0xf]  ;;  %v3871_v45 = vld [vmem:[#allocation9 + $0x50] sm:$0xff] }
 0x1a2   : > { %1720 = vmatpush.bf16.msrb.mxu1 %v3927_v46  ;;  %v3249_v41 = vor.u32 %v3896_v37, %v3248_v36  ;;  %v3847_v43 = vld [vmem:[#allocation2 + $0x50] sm:$0xf0]  ;;  %v3964_v46 = vld [vmem:[#allocation9 + $0x1b8] sm:$0xff]  ;;  %v3444_v59 = vld [vmem:[#allocation2 + $0x60] sm:$0xf] }
 0x1a3   : > { %2041 = vmatpush.bf16.msrb.mxu0 %v3863_v49  ;;  %v3433_v44 = vor.u32 %v3847_v43, %v3432_v42  ;;  %v3252_v49 = vld [vmem:[#allocation2 + $0x78] sm:$0xf]  ;;  %v3850_v60 = vld [vmem:[#allocation2 + $0x68] sm:$0xf0]  ;;  %v3961_v5 = vld [vmem:[#allocation9 + $0x1a0] sm:$0xff] }
 0x1a4   : > { %1623 = vmatpush.bf16.msra.mxu2 %v3910_v50  ;;  %v3898_v50 = vld [vmem:[#allocation2 + $0x80] sm:$0xf0]  ;;  %v3445_v61 = vor.u32 %v3850_v60, %v3444_v59  ;;  %v3870_v62 = vld [vmem:[#allocation9 + $0x48] sm:$0xff]  ;;  %v3884_v63 = vld [vmem:[#allocation9 + $0xb8] sm:$0xff] }
 0x1a5   : > { %1672 = vmatpush.bf16.msra.mxu3 %v3918_v51  ;;  %v3897_v51 = vld [vmem:[#allocation2 + $0x7c] sm:$0xf]  ;;  %v3902_v11 = vld [vmem:[#allocation2 + $0xa0] sm:$0xf0]  ;;  %v3881_v18 = vld [vmem:[#allocation9 + $0xa0] sm:$0xff] }
 0x1a6   : > { %1721 = vmatpush.bf16.msrb.mxu1 %v3926_v52  ;;  %v3254_v52 = vld [vmem:[#allocation2 + $0x84] sm:$0xf0]  ;;  %v3901_v6 = vld [vmem:[#allocation2 + $0x98] sm:$0xf0]  ;;  %v3456_v30 = vld [vmem:[#allocation2 + $0x78] sm:$0xf] }
 0x1a7   : > { %2042 = vmatpush.bf16.msrb.mxu0 %v3862_v58  ;;  %v3257_v57 = vor.u32 %v3897_v51, %v3254_v52  ;;  %v3869_v19 = vld [vmem:[#allocation9 + $0x40] sm:$0xff]  ;;  %v3880_v20 = vld [vmem:[#allocation9 + $0x98] sm:$0xff]  ;;  %v3879_v40 = vld [vmem:[#allocation9 + $0x90] sm:$0xff] }
 0x1a8   : > { %1624 = vmatpush.bf16.msra.mxu2 %v3909_v54  ;;  %v3260_v54 = vld [vmem:[#allocation2 + $0x80] sm:$0xf]  ;;  %v3958_v23 = vld [vmem:[#allocation9 + $0x188] sm:$0xff]  ;;  %v3276_v48 = vld [vmem:[#allocation2 + $0xa8] sm:$0xf] }
 0x1a9   : > { %1673 = vmatpush.bf16.msra.mxu3 %v3917_v55  ;;  %v3899_v55 = vld [vmem:[#allocation2 + $0x88] sm:$0xf0]  ;;  %v3878_v47 = vld [vmem:[#allocation9 + $0x88] sm:$0xff]  ;;  %v3904_v53 = vld [vmem:[#allocation2 + $0xb0] sm:$0xf0] }
 0x1aa   : > { %1722 = vmatpush.bf16.msrb.mxu1 %v3925_v56  ;;  %v3253_v56 = vor.u32 %v3898_v50, %v3252_v49  ;;  %v3261_v58 = vor.u32 %v3899_v55, %v3260_v54  ;;  %v3903_v8 = vld [vmem:[#allocation2 + $0xac] sm:$0xf]  ;;  %v3277_v27 = vor.u32 %v3904_v53, %v3276_v48  ;;  %v3468_v32 = vld [vmem:[#allocation2 + $0x90] sm:$0xf]  ;;  %v3856_v33 = vld [vmem:[#allocation2 + $0x98] sm:$0xf0] }
 0x1ab   : > { %1625 = vmatmul.bf16.vlgmr.msra.gmra.mxu2 %v3205_v1  ;;  %2043 = vmatpush.bf16.msrb.mxu0 %v3861_v4  ;;  %v3883_v1 = vld [vmem:[#allocation9 + $0xb0] sm:$0xff]  ;;  %v3264_v4 = vld [vmem:[#allocation2 + $0x90] sm:$0xf]  ;;  %v3469_v35 = vor.u32 %v3856_v33, %v3468_v32  ;;  %v4866_v36 = vld [vmem:[#allocation9 + $0x238] sm:$0xff] }
 0x1ac   : > { %2085 = vmatpush.bf16.msrb.mxu2 %v3876_v0  ;;  %1674 = vmatmul.bf16.vlgmr.msra.gmra.mxu3 %v3209_v2  ;;  %v3963_v0 = vld [vmem:[#allocation9 + $0x1b0] sm:$0xff]  ;;  %v3962_v2 = vld [vmem:[#allocation9 + $0x1a8] sm:$0xff]  ;;  %v3265_v12 = vor.u32 %v3901_v6, %v3264_v4  ;;  %v3877_v34 = vld [vmem:[#allocation9 + $0x80] sm:$0xff] }
 0x1ad   : > { %1723 = vmatmul.bf16.vlgmr.msrb.gmra.mxu1 %v3213_v3  ;;  %2134 = vmatpush.bf16.msrb.mxu3 %v3884_v63  ;;  %v3882_v3 = vld [vmem:[#allocation9 + $0xa8] sm:$0xff]  ;;  %v3971_v37 = vld [vmem:[#allocation9 + $0x1f0] sm:$0xff]  ;;  %v3290_v42 = vld [vmem:[#allocation2 + $0xcc] sm:$0xf0] }
 0x1ae   : > { %2044 = vmatmul.bf16.vlgmr.msrb.gmra.mxu0 %v3397_v9  ;;  %2537 = vmatpush.bf16.msra.mxu1 %v3964_v46  ;;  %v3266_v9 = vld [vmem:[#allocation2 + $0x9c] sm:$0xf0]  ;;  %v3296_v43 = vld [vmem:[#allocation2 + $0xc8] sm:$0xf]  ;;  %v3859_v51 = vld [vmem:[#allocation2 + $0xb0] sm:$0xf0] }
 0x1af   : > { %v3480_v50 = vld [vmem:[#allocation2 + $0xa8] sm:$0xf]  ;;  %v4869_v54 = vld [vmem:[#allocation9 + $0x230] sm:$0xff]  ;;  %v3970_v55 = vld [vmem:[#allocation9 + $0x1e8] sm:$0xff] }
 0x1b0   : > { %2086 = vmatpush.bf16.msrb.mxu2 %v3875_v7  ;;  %v3900_v7 = vld [vmem:[#allocation2 + $0x94] sm:$0xf]  ;;  %v3481_v52 = vor.u32 %v3859_v51, %v3480_v50  ;;  %v3588_v60 = vld [vmem:[#allocation2 + $0x30] sm:$0xf]  ;;  %v3422_v33 = vld [vmem:[#allocation2 + $0x3c] sm:$0xf0] }
 0x1b1   : > { %2135 = vmatpush.bf16.msrb.mxu3 %v3883_v1  ;;  %v3269_v13 = vor.u32 %v3900_v7, %v3266_v9  ;;  %v3839_v59 = vld [vmem:[#allocation2 + $0x10] sm:$0xf0]  ;;  %v4890_v51 = vld [vmem:[#allocation9 + $0x218] sm:$0xff] }
 0x1b2   : > { %2538 = vmatpush.bf16.msra.mxu1 %v3963_v0  ;;  %v3969_v7 = vld [vmem:[#allocation9 + $0x1e0] sm:$0xff] }
 0x1b3   : > { %v4881_v53 = vld [vmem:[#allocation9 + $0x220] sm:$0xff] }
 0x1b4   : > { %2087 = vmatpush.bf16.msrb.mxu2 %v3874_v10  ;;  %v3272_v10 = vld [vmem:[#allocation2 + $0x98] sm:$0xf] }
 0x1b5   : > { %2136 = vmatpush.bf16.msrb.mxu3 %v3882_v3  ;;  %v3273_v14 = vor.u32 %v3902_v11, %v3272_v10  ;;  %v4872_v3 = vld [vmem:[#allocation9 + $0x228] sm:$0xff] }
 0x1b6   : > { %2539 = vmatpush.bf16.msra.mxu1 %v3962_v2 }
 0x1b8   : > { %2088 = vmatpush.bf16.msrb.mxu2 %v3873_v22  ;;  %v3959_v22 = vld [vmem:[#allocation9 + $0x190] sm:$0xff] }
 0x1b9   : > { %2137 = vmatpush.bf16.msrb.mxu3 %v3881_v18  ;;  %v3840_v18 = vld [vmem:[#allocation2 + $0x1c] sm:$0xf] }
 0x1ba   : > { %2540 = vmatpush.bf16.msra.mxu1 %v3961_v5 }
 0x1bb   : > { %1630 = vmatmul.bf16.gmra.mxu2 %v3217_v15  ;;  %v3853_v15 = vld [vmem:[#allocation2 + $0x80] sm:$0xf0] }
 0x1bc   : > { %1679 = vmatmul.bf16.gmra.mxu3 %v3221_v16  ;;  %2089 = vmatpush.bf16.msrb.mxu2 %v3872_v31  ;;  %v3457_v16 = vor.u32 %v3853_v15, %v3456_v30  ;;  %v3842_v30 = vld [vmem:[#allocation2 + $0x28] sm:$0xf0]  ;;  %v3600_v15 = vld [vmem:[#allocation2 + $0x48] sm:$0xf] }
 0x1bd   : > { %1728 = vmatmul.bf16.gmra.mxu1 %v3225_v17  ;;  %v3960_v17 = vld [vmem:[#allocation9 + $0x198] sm:$0xff]  ;;  %2138 = vmatpush.bf16.msrb.mxu3 %v3880_v20 }
 0x1be   : > { %2049 = vmatmul.bf16.gmra.mxu0 %v3409_v21  ;;  %v3972_v21 = vld [vmem:[#allocation9 + $0x1f8] sm:$0xff]  ;;  %2541 = vmatpush.bf16.msra.mxu1 %v3960_v17 }
 0x1bf   : > { %2586 = vmatpush.bf16.msra.mxu0 %v3972_v21 }
 0x1c0   : > { %2090 = vmatpush.bf16.msrb.mxu2 %v3871_v45 }
 0x1c1   : > { %2139 = vmatpush.bf16.msrb.mxu3 %v3879_v40 }
 0x1c2   : > { %2542 = vmatpush.bf16.msra.mxu1 %v3959_v22 }
 0x1c3   : > { %2587 = vmatpush.bf16.msra.mxu0 %v3971_v37 }
 0x1c4   : > { %2091 = vmatpush.bf16.msrb.mxu2 %v3870_v62 }
 0x1c5   : > { %2140 = vmatpush.bf16.msrb.mxu3 %v3878_v47 }
 0x1c6   : > { %2543 = vmatpush.bf16.msra.mxu1 %v3958_v23 }
 0x1c7   : > { %2588 = vmatpush.bf16.msra.mxu0 %v3970_v55 }
 0x1c8   : > { %2092 = vmatpush.bf16.msrb.mxu2 %v3869_v19 }
 0x1c9   : > { %2141 = vmatpush.bf16.msrb.mxu3 %v3877_v34  ;;  %v3428_v34 = vld [vmem:[#allocation2 + $0x38] sm:$0xf] }
 0x1cb   : > { %1635 = vmatmul.bf16.gmra.mxu2 %v3229_v24  ;;  %v3278_v24 = vld [vmem:[#allocation2 + $0xb4] sm:$0xf0]  ;;  %2589 = vmatpush.bf16.msra.mxu0 %v3969_v7 }
 0x1cc   : > { %1684 = vmatmul.bf16.gmra.mxu3 %v3233_v25  ;;  %v3284_v25 = vld [vmem:[#allocation2 + $0xb0] sm:$0xf]  ;;  %v3281_v28 = vor.u32 %v3903_v8, %v3278_v24  ;;  %4037 = vmatpush.bf16.msra.mxu2 %v4866_v36 }
 0x1cd   : > { %1733 = vmatmul.bf16.gmra.mxu1 %v3237_v26  ;;  %v3905_v26 = vld [vmem:[#allocation2 + $0xb8] sm:$0xf0] }
 0x1ce   : > { %2054 = vmatmul.bf16.gmra.mxu0 %v3421_v29  ;;  %v3957_v29 = vld [vmem:[#allocation9 + $0x180] sm:$0xff]  ;;  %v3285_v31 = vor.u32 %v3905_v26, %v3284_v25  ;;  %v3968_v26 = vld [vmem:[#allocation9 + $0x1d8] sm:$0xff] }
 0x1cf   : > { %2544 = vmatpush.bf16.msra.mxu1 %v3957_v29  ;;  %2590 = vmatpush.bf16.msra.mxu0 %v3968_v26 }
 0x1d0   : > { %4038 = vmatpush.bf16.msra.mxu2 %v4869_v54 }
 0x1d3   : > { %4029 = vmatpush.bf16.msrb.mxu1 %v3972_v21 }
 0x1d4   : > { %4039 = vmatpush.bf16.msra.mxu2 %v4872_v3 }
 0x1d7   : > { %4030 = vmatpush.bf16.msrb.mxu1 %v3971_v37  ;;  %v3612_v37 = vld [vmem:[#allocation2 + $0x60] sm:$0xf] }
 0x1d8   : > { %4040 = vmatpush.bf16.msra.mxu2 %v4881_v53 }
 0x1db   : > { %1640 = vmatmul.bf16.gmra.mxu2 %v3241_v38  ;;  %v3288_v38 = vld [vmem:[#allocation2 + $0xc0] sm:$0xf]  ;;  %4031 = vmatpush.bf16.msrb.mxu1 %v3970_v55 }
 0x1dc   : > { %1689 = vmatmul.bf16.gmra.mxu3 %v3245_v39  ;;  %v3907_v39 = vld [vmem:[#allocation2 + $0xc8] sm:$0xf0]  ;;  %4041 = vmatpush.bf16.msra.mxu2 %v4890_v51 }
 0x1dd   : > { %1738 = vmatmul.bf16.gmra.mxu1 %v3249_v41  ;;  %v3906_v41 = vld [vmem:[#allocation2 + $0xc4] sm:$0xf]  ;;  %v3289_v45 = vor.u32 %v3907_v39, %v3288_v38  ;;  %v3940_v38 = vld [vmem:[#allocation2 + $0x68] sm:$0xf0] }
 0x1de   : > { %2059 = vmatmul.bf16.gmra.mxu0 %v3433_v44  ;;  %v3908_v44 = vld [vmem:[#allocation2 + $0xd0] sm:$0xf0]  ;;  %v3293_v46 = vor.u32 %v3906_v41, %v3290_v42 }
 0x1df   : > { %v3297_v49 = vor.u32 %v3908_v44, %v3296_v43  ;;  %4032 = vmatpush.bf16.msrb.mxu1 %v3969_v7 }
 0x1e3   : > { %4033 = vmatpush.bf16.msrb.mxu1 %v3968_v26 }
 0x1eb   : > { %1645 = vmatmul.bf16.gmra.mxu2 %v3253_v56  ;;  %v3837_v56 = vld [vmem:[#allocation2 + $0x4] sm:$0xf] }
 0x1ec   : > { %1694 = vmatmul.bf16.gmra.mxu3 %v3257_v57  ;;  %v3398_v57 = vld [vmem:[#allocation2 + $0xc] sm:$0xf0] }
 0x1ed   : > { %1743 = vmatmul.bf16.gmra.mxu1 %v3261_v58  ;;  %v3404_v58 = vld [vmem:[#allocation2 + $0x8] sm:$0xf]  ;;  %v3401_v62 = vor.u32 %v3837_v56, %v3398_v57  ;;  %v3967_v57 = vld [vmem:[#allocation9 + $0x1d0] sm:$0xff] }
 0x1ee   : > { %2064 = vmatmul.bf16.gmra.mxu0 %v3445_v61  ;;  %v3934_v61 = vld [vmem:[#allocation2 + $0x38] sm:$0xf0]  ;;  %v3405_v63 = vor.u32 %v3839_v59, %v3404_v58  ;;  %4034 = vmatpush.bf16.msrb.mxu1 %v3967_v57 }
 0x1ef   : > { %v3589_v0 = vor.u32 %v3934_v61, %v3588_v60  ;;  %2591 = vmatpush.bf16.msra.mxu0 %v3967_v57  ;;  %v3846_v61 = vld [vmem:[#allocation2 + $0x4c] sm:$0xf] }
 0x1fb   : > { %1650 = vmatmul.bf16.gmra.mxu2 %v3265_v12 }
 0x1fc   : > { %1699 = vmatmul.bf16.gmra.mxu3 %v3269_v13  ;;  %v3410_v13 = vld [vmem:[#allocation2 + $0x24] sm:$0xf0] }
 0x1fd   : > { %1748 = vmatmul.bf16.gmra.mxu1 %v3273_v14  ;;  %v3416_v14 = vld [vmem:[#allocation2 + $0x20] sm:$0xf]  ;;  %v3413_v21 = vor.u32 %v3840_v18, %v3410_v13  ;;  %v3966_v18 = vld [vmem:[#allocation9 + $0x1c8] sm:$0xff] }
 0x1fe   : > { %2069 = vmatmul.bf16.gmra.mxu0 %v3457_v16  ;;  %v3937_v16 = vld [vmem:[#allocation2 + $0x50] sm:$0xf0]  ;;  %v3417_v22 = vor.u32 %v3842_v30, %v3416_v14  ;;  %4035 = vmatpush.bf16.msrb.mxu1 %v3966_v18 }
 0x1ff   : > { %v3601_v40 = vor.u32 %v3937_v16, %v3600_v15  ;;  %2592 = vmatpush.bf16.msra.mxu0 %v3966_v18  ;;  %v3965_v15 = vld [vmem:[#allocation9 + $0x1c0] sm:$0xff] }
 0x202   : > { %4036 = vmatpush.bf16.msrb.mxu1 %v3965_v15 }
 0x203   : > { %2593 = vmatpush.bf16.msra.mxu0 %v3965_v15 }
 0x20b   : > { %1655 = vmatmul.bf16.gmra.mxu2 %v3277_v27 }
 0x20c   : > { %1704 = vmatmul.bf16.gmra.mxu3 %v3281_v28 }
 0x20d   : > { %1753 = vmatmul.bf16.gmra.mxu1 %v3285_v31  ;;  %v3843_v31 = vld [vmem:[#allocation2 + $0x34] sm:$0xf] }
 0x20e   : > { %2074 = vmatmul.bf16.gmra.mxu0 %v3469_v35  ;;  %v3845_v35 = vld [vmem:[#allocation2 + $0x40] sm:$0xf0]  ;;  %v3425_v43 = vor.u32 %v3843_v31, %v3422_v33  ;;  %v3851_v31 = vld [vmem:[#allocation2 + $0x70] sm:$0xf0]  ;;  %v3636_v33 = vld [vmem:[#allocation2 + $0x90] sm:$0xf] }
 0x20f   : > { %v3429_v44 = vor.u32 %v3845_v35, %v3428_v34  ;;  %v3946_v34 = vld [vmem:[#allocation2 + $0x98] sm:$0xf0] }
 0x21b   : > { %1660 = vmatmul.bf16.gmra.mxu2 %v3289_v45  ;;  %v3613_v45 = vor.u32 %v3940_v38, %v3612_v37 }
 0x21c   : > { %1709 = vmatmul.bf16.gmra.mxu3 %v3293_v46 }
 0x21d   : > { %1758 = vmatmul.bf16.gmra.mxu1 %v3297_v49 }
 0x21e   : > { %2079 = vmatmul.bf16.gmra.mxu0 %v3481_v52 }
 0x22a   : > { %v1724_v1 = vpop.f32.mrf.mxu1 }
 0x22b   : > { %2093 = vmatmul.bf16.vlgmr.msrb.gmra.mxu2 %v3401_v62  ;;  %v2045_v2 = vpop.f32.mrf.mxu0 }
 0x22c   : > { %2142 = vmatmul.bf16.vlgmr.msrb.gmra.mxu3 %v3405_v63  ;;  %v3434_v63 = vld [vmem:[#allocation2 + $0x54] sm:$0xf0] }
 0x22d   : > { %2545 = vmatmul.bf16.vlgmr.msra.gmra.mxu1 %v3589_v0  ;;  %v3440_v0 = vld [vmem:[#allocation2 + $0x50] sm:$0xf] }
 0x22e   : > { %v1626_v4 = vpop.f32.mrf.mxu2  ;;  %2635 = vmatpush.bf16.msra.mxu1 %v4866_v36 }
 0x22f   : > { %v1675_v5 = vpop.f32.mrf.mxu3 }
 0x230   : > { %v1676_v6 = vadd.f32 %v1675_v5, %v1626_v4  ;;  %v3943_v4 = vld [vmem:[#allocation2 + $0x80] sm:$0xf0] }
 0x232   : > { %v1726_v9 = vpop.f32.mrf.mxu1  ;;  %v1725_v10 = vadd.f32 %v1724_v1, %v1676_v6  ;;  %v3848_v1 = vld [vmem:[#allocation2 + $0x58] sm:$0xf0]  ;;  %2636 = vmatpush.bf16.msra.mxu1 %v4869_v54 }
 0x233   : > { %v4877_v12 = vpop.f32.mrf.mxu0 }
 0x234   : > { %v4875_v11 = vadd.f32 %v2045_v2, %v1725_v10  ;;  %v3624_v2 = vld [vmem:[#allocation2 + $0x78] sm:$0xf]  ;;  %v3441_v10 = vor.u32 %v3848_v1, %v3440_v0  ;;  %v3464_v0 = vld [vmem:[#allocation2 + $0x80] sm:$0xf]  ;;  %v3854_v1 = vld [vmem:[#allocation2 + $0x88] sm:$0xf0] }
 0x235   : > { %v3625_v13 = vor.u32 %v3943_v4, %v3624_v2  ;;  %v3648_v2 = vld [vmem:[#allocation2 + $0xa8] sm:$0xf]  ;;  %v3949_v4 = vld [vmem:[#allocation2 + $0xb0] sm:$0xf0] }
 0x236   : > { %v1628_v17 = vpop.f32.mrf.mxu2  ;;  %2637 = vmatpush.bf16.msra.mxu1 %v4872_v3 }
 0x237   : > { %v1677_v19 = vpop.f32.mrf.mxu3 }
 0x238   : > { %v1678_v20 = vadd.f32 %v1677_v19, %v1628_v17  ;;  %v3975_v17 = vld [vmem:[#allocation9 + $0x210] sm:$0xff]  ;;  %v3933_v19 = vld [vmem:[#allocation2 + $0x34] sm:$0xf] }
 0x239   : > { %4042 = vmatpush.bf16.msra.mxu2 %v3975_v17 }
 0x23a   : > { %v1729_v23 = vpop.f32.mrf.mxu1  ;;  %v4879_v47 = vadd.f32 %v1726_v9, %v1678_v20  ;;  %v3437_v9 = vor.u32 %v3846_v61, %v3434_v63  ;;  %v3590_v20 = vld [vmem:[#allocation2 + $0x3c] sm:$0xf0]  ;;  %2638 = vmatpush.bf16.msra.mxu1 %v4881_v53  ;;  %v3458_v63 = vld [vmem:[#allocation2 + $0x84] sm:$0xf0] }
 0x23b   : > { %2098 = vmatmul.bf16.gmra.mxu2 %v3413_v21  ;;  %v2050_v48 = vpop.f32.mrf.mxu0 }
 0x23c   : > { %2147 = vmatmul.bf16.gmra.mxu3 %v3417_v22 }
 0x23d   : > { %2550 = vmatmul.bf16.gmra.mxu1 %v3601_v40  ;;  %v3593_v40 = vor.u32 %v3933_v19, %v3590_v20  ;;  %v3614_v19 = vld [vmem:[#allocation2 + $0x6c] sm:$0xf0] }
 0x23e   : > { %v1631_v8 = vpop.f32.mrf.mxu2  ;;  %2639 = vmatpush.bf16.msra.mxu1 %v4890_v51  ;;  %v3465_v51 = vor.u32 %v3854_v1, %v3464_v0  ;;  %v3482_v0 = vld [vmem:[#allocation2 + $0xb4] sm:$0xf0]  ;;  %v3488_v1 = vld [vmem:[#allocation2 + $0xb0] sm:$0xf] }
 0x23f   : > { %v1680_v24 = vpop.f32.mrf.mxu3  ;;  %2594 = vmatmul.bf16.vlgmr.msra.gmra.mxu0 %v3593_v40 }
 0x240   : > { %v1681_v25 = vadd.f32 %v1680_v24, %v1631_v8 }
 0x242   : > { %v1731_v27 = vpop.f32.mrf.mxu1  ;;  %v1730_v28 = vadd.f32 %v1729_v23, %v1681_v25  ;;  %v3849_v25 = vld [vmem:[#allocation2 + $0x64] sm:$0xf]  ;;  %2640 = vmatpush.bf16.msra.mxu1 %v3975_v17 }
 0x243   : > { %v4886_v32 = vpop.f32.mrf.mxu0  ;;  %v3939_v17 = vld [vmem:[#allocation2 + $0x64] sm:$0xf] }
 0x244   : > { %v4884_v29 = vadd.f32 %v2050_v48, %v1730_v28  ;;  %v3452_v28 = vld [vmem:[#allocation2 + $0x68] sm:$0xf] }
 0x246   : > { %v1633_v39 = vpop.f32.mrf.mxu2 }
 0x247   : > { %v1682_v41 = vpop.f32.mrf.mxu3 }
 0x248   : > { %v1683_v42 = vadd.f32 %v1682_v41, %v1633_v39  ;;  %v3453_v39 = vor.u32 %v3851_v31, %v3452_v28  ;;  %v3637_v41 = vor.u32 %v3946_v34, %v3636_v33  ;;  %v3476_v28 = vld [vmem:[#allocation2 + $0x98] sm:$0xf]  ;;  %v3857_v31 = vld [vmem:[#allocation2 + $0xa0] sm:$0xf0]  ;;  %v3660_v33 = vld [vmem:[#allocation2 + $0xc0] sm:$0xf] }
 0x249   : > { %v3952_v34 = vld [vmem:[#allocation2 + $0xc8] sm:$0xf0] }
 0x24a   : > { %v1734_v46 = vpop.f32.mrf.mxu1  ;;  %v4888_v49 = vadd.f32 %v1731_v27, %v1683_v42  ;;  %v3446_v27 = vld [vmem:[#allocation2 + $0x6c] sm:$0xf0] }
 0x24b   : > { %2103 = vmatmul.bf16.gmra.mxu2 %v3425_v43  ;;  %v2055_v50 = vpop.f32.mrf.mxu0  ;;  %v3449_v38 = vor.u32 %v3849_v25, %v3446_v27  ;;  %v3855_v25 = vld [vmem:[#allocation2 + $0x94] sm:$0xf]  ;;  %v3470_v27 = vld [vmem:[#allocation2 + $0x9c] sm:$0xf0] }
 0x24c   : > { %2152 = vmatmul.bf16.gmra.mxu3 %v3429_v44 }
 0x24d   : > { %2555 = vmatmul.bf16.gmra.mxu1 %v3613_v45  ;;  %v3974_v45 = vld [vmem:[#allocation9 + $0x208] sm:$0xff] }
 0x24e   : > { %v1636_v52 = vpop.f32.mrf.mxu2  ;;  %4043 = vmatpush.bf16.msra.mxu2 %v3974_v45  ;;  %2641 = vmatpush.bf16.msra.mxu1 %v3974_v45 }
 0x24f   : > { %v1685_v55 = vpop.f32.mrf.mxu3 }
 0x250   : > { %v1686_v56 = vadd.f32 %v1685_v55, %v1636_v52 }
 0x252   : > { %v1736_v58 = vpop.f32.mrf.mxu1  ;;  %v1735_v59 = vadd.f32 %v1734_v46, %v1686_v56  ;;  %v3936_v46 = vld [vmem:[#allocation2 + $0x4c] sm:$0xf] }
 0x253   : > { %v4895_v62 = vpop.f32.mrf.mxu0 }
 0x254   : > { %v4893_v60 = vadd.f32 %v2055_v50, %v1735_v59  ;;  %v3602_v50 = vld [vmem:[#allocation2 + $0x54] sm:$0xf0]  ;;  %v3852_v59 = vld [vmem:[#allocation2 + $0x7c] sm:$0xf] }
 0x255   : > { %v3605_v3 = vor.u32 %v3936_v46, %v3602_v50  ;;  %v3942_v46 = vld [vmem:[#allocation2 + $0x7c] sm:$0xf]  ;;  %v3626_v50 = vld [vmem:[#allocation2 + $0x84] sm:$0xf0] }
 0x256   : > { %v1638_v5 = vpop.f32.mrf.mxu2 }
 0x257   : > { %v1687_v6 = vpop.f32.mrf.mxu3  ;;  %2599 = vmatmul.bf16.gmra.mxu0 %v3605_v3  ;;  %v3629_v3 = vor.u32 %v3942_v46, %v3626_v50  ;;  %v3948_v46 = vld [vmem:[#allocation2 + $0xac] sm:$0xf]  ;;  %v3650_v50 = vld [vmem:[#allocation2 + $0xb4] sm:$0xf0] }
 0x258   : > { %v1688_v7 = vadd.f32 %v1687_v6, %v1638_v5 }
 0x25a   : > { %v1739_v14 = vpop.f32.mrf.mxu1  ;;  %v4897_v30 = vadd.f32 %v1736_v58, %v1688_v7 }
 0x25b   : > { %2108 = vmatmul.bf16.gmra.mxu2 %v3437_v9  ;;  %v2060_v16 = vpop.f32.mrf.mxu0  ;;  %v3461_v9 = vor.u32 %v3852_v59, %v3458_v63 }
 0x25c   : > { %2157 = vmatmul.bf16.gmra.mxu3 %v3441_v10  ;;  %v3649_v10 = vor.u32 %v3949_v4, %v3648_v2  ;;  %v3860_v2 = vld [vmem:[#allocation2 + $0xb8] sm:$0xf0]  ;;  %v3672_v4 = vld [vmem:[#allocation2 + $0xd8] sm:$0xf] }
 0x25d   : > { %2560 = vmatmul.bf16.gmra.mxu1 %v3625_v13 }
 0x25e   : > { %v1641_v21 = vpop.f32.mrf.mxu2 }
 0x25f   : > { %v1690_v22 = vpop.f32.mrf.mxu3 }
 0x260   : > { %v1691_v23 = vadd.f32 %v1690_v22, %v1641_v21  ;;  %v3617_v22 = vor.u32 %v3939_v17, %v3614_v19  ;;  %v3945_v19 = vld [vmem:[#allocation2 + $0x94] sm:$0xf] }
 0x262   : > { %v1741_v48 = vpop.f32.mrf.mxu1  ;;  %v1740_v8 = vadd.f32 %v1739_v14, %v1691_v23 }
 0x263   : > { %v2062_v26 = vpop.f32.mrf.mxu0 }
 0x264   : > { %v4901_v24 = vadd.f32 %v2060_v16, %v1740_v8  ;;  %v3973_v16 = vld [vmem:[#allocation9 + $0x200] sm:$0xff] }
 0x265   : > { %4044 = vmatpush.bf16.msra.mxu2 %v3973_v16  ;;  %2642 = vmatpush.bf16.msra.mxu1 %v3973_v16 }
 0x266   : > { %v1643_v35 = vpop.f32.mrf.mxu2 }
 0x267   : > { %v1692_v37 = vpop.f32.mrf.mxu3  ;;  %2604 = vmatmul.bf16.gmra.mxu0 %v3617_v22 }
 0x268   : > { %v1693_v36 = vadd.f32 %v1692_v37, %v1643_v35 }
 0x26a   : > { %v1744_v42 = vpop.f32.mrf.mxu1  ;;  %v1742_v43 = vadd.f32 %v1741_v48, %v1693_v36 }
 0x26b   : > { %2113 = vmatmul.bf16.gmra.mxu2 %v3449_v38  ;;  %v2065_v44 = vpop.f32.mrf.mxu0  ;;  %v3473_v38 = vor.u32 %v3855_v25, %v3470_v27 }
 0x26c   : > { %v4905_v54 = vadd.f32 %v2062_v26, %v1742_v43  ;;  %2162 = vmatmul.bf16.gmra.mxu3 %v3453_v39  ;;  %v3477_v39 = vor.u32 %v3857_v31, %v3476_v28  ;;  %v3608_v28 = vld [vmem:[#allocation2 + $0x50] sm:$0xf]  ;;  %v3938_v31 = vld [vmem:[#allocation2 + $0x58] sm:$0xf0] }
 0x26d   : > { %2565 = vmatmul.bf16.gmra.mxu1 %v3637_v41  ;;  %v3661_v41 = vor.u32 %v3952_v34, %v3660_v33  ;;  %v3954_v33 = vld [vmem:[#allocation2 + $0xdc] sm:$0xf]  ;;  %v3674_v34 = vld [vmem:[#allocation2 + $0xe4] sm:$0xf0] }
 0x26e   : > { %v1646_v52 = vpop.f32.mrf.mxu2 }
 0x26f   : > { %v1695_v55 = vpop.f32.mrf.mxu3 }
 0x270   : > { %v1696_v56 = vadd.f32 %v1695_v55, %v1646_v52 }
 0x272   : > { %v1746_v57 = vpop.f32.mrf.mxu1  ;;  %v1745_v58 = vadd.f32 %v1744_v42, %v1696_v56 }
 0x273   : > { %v2067_v61 = vpop.f32.mrf.mxu0 }
 0x274   : > { %v4908_v53 = vadd.f32 %v2065_v44, %v1745_v58 }
 0x276   : > { %v1648_v5 = vpop.f32.mrf.mxu2 }
 0x277   : > { %v1697_v6 = vpop.f32.mrf.mxu3  ;;  %2609 = vmatmul.bf16.gmra.mxu0 %v3629_v3 }
 0x278   : > { %v1698_v7 = vadd.f32 %v1697_v6, %v1648_v5  ;;  %v3955_v5 = vld [vmem:[#allocation2 + $0xe0] sm:$0xf0] }
 0x27a   : > { %v1749_v18 = vpop.f32.mrf.mxu1  ;;  %v1747_v13 = vadd.f32 %v1746_v57, %v1698_v7 }
 0x27b   : > { %2118 = vmatmul.bf16.gmra.mxu2 %v3461_v9  ;;  %v2070_v15 = vpop.f32.mrf.mxu0 }
 0x27c   : > { %v4910_v14 = vadd.f32 %v2067_v61, %v1747_v13  ;;  %2167 = vmatmul.bf16.gmra.mxu3 %v3465_v51  ;;  %v3858_v61 = vld [vmem:[#allocation2 + $0xac] sm:$0xf] }
 0x27d   : > { %2570 = vmatmul.bf16.gmra.mxu1 %v3649_v10  ;;  %v3485_v51 = vor.u32 %v3858_v61, %v3482_v0  ;;  %v3489_v10 = vor.u32 %v3860_v2, %v3488_v1  ;;  %v3941_v61 = vld [vmem:[#allocation2 + $0x70] sm:$0xf0]  ;;  %v3596_v0 = vld [vmem:[#allocation2 + $0x38] sm:$0xf]  ;;  %v3935_v1 = vld [vmem:[#allocation2 + $0x40] sm:$0xf0] }
 0x27e   : > { %v1651_v20 = vpop.f32.mrf.mxu2 }
 0x27f   : > { %v1700_v21 = vpop.f32.mrf.mxu3 }
 0x280   : > { %v1701_v40 = vadd.f32 %v1700_v21, %v1651_v20  ;;  %v3638_v20 = vld [vmem:[#allocation2 + $0x9c] sm:$0xf0] }
 0x282   : > { %v1751_v23 = vpop.f32.mrf.mxu1  ;;  %v1750_v48 = vadd.f32 %v1749_v18, %v1701_v40  ;;  %v3673_v18 = vor.u32 %v3955_v5, %v3672_v4  ;;  %v3641_v40 = vor.u32 %v3945_v19, %v3638_v20 }
 0x283   : > { %v2072_v26 = vpop.f32.mrf.mxu0 }
 0x284   : > { %v4912_v8 = vadd.f32 %v2070_v15, %v1750_v48 }
 0x286   : > { %v1653_v35 = vpop.f32.mrf.mxu2 }
 0x287   : > { %v1702_v37 = vpop.f32.mrf.mxu3  ;;  %2614 = vmatmul.bf16.gmra.mxu0 %v3641_v40 }
 0x288   : > { %v1703_v36 = vadd.f32 %v1702_v37, %v1653_v35 }
 0x28a   : > { %v1754_v42 = vpop.f32.mrf.mxu1  ;;  %v1752_v43 = vadd.f32 %v1751_v23, %v1703_v36 }
 0x28b   : > { %2123 = vmatmul.bf16.gmra.mxu2 %v3473_v38  ;;  %v2075_v45 = vpop.f32.mrf.mxu0  ;;  %v3609_v38 = vor.u32 %v3938_v31, %v3608_v28 }
 0x28c   : > { %v4914_v44 = vadd.f32 %v2072_v26, %v1752_v43  ;;  %2172 = vmatmul.bf16.gmra.mxu3 %v3477_v39  ;;  %v3988_v26 = vld [vmem:[#allocation11 + $0x38] sm:$0xff] }
 0x28d   : > { %2575 = vmatmul.bf16.gmra.mxu1 %v3661_v41  ;;  %4045 = vmatpush.bf16.msra.mxu3 %v3988_v26  ;;  %v3677_v41 = vor.u32 %v3954_v33, %v3674_v34 }
 0x28e   : > { %v1656_v52 = vpop.f32.mrf.mxu2 }
 0x28f   : > { %v1705_v55 = vpop.f32.mrf.mxu3 }
 0x290   : > { %v1706_v56 = vadd.f32 %v1705_v55, %v1656_v52  ;;  %v3653_v55 = vor.u32 %v3948_v46, %v3650_v50  ;;  %v3983_v50 = vld [vmem:[#allocation11 + $0x10] sm:$0xff] }
 0x292   : > { %v1756_v57 = vpop.f32.mrf.mxu1  ;;  %v1755_v58 = vadd.f32 %v1754_v42, %v1706_v56 }
 0x293   : > { %v2077_v63 = vpop.f32.mrf.mxu0 }
 0x294   : > { %v4916_v59 = vadd.f32 %v2075_v45, %v1755_v58  ;;  %v3620_v58 = vld [vmem:[#allocation2 + $0x68] sm:$0xf] }
 0x295   : > { %v3621_v5 = vor.u32 %v3941_v61, %v3620_v58 }
 0x296   : > { %v1658_v6 = vpop.f32.mrf.mxu2 }
 0x297   : > { %v1707_v7 = vpop.f32.mrf.mxu3  ;;  %2619 = vmatmul.bf16.gmra.mxu0 %v3653_v55  ;;  %v3953_v55 = vld [vmem:[#allocation2 + $0xd0] sm:$0xf0] }
 0x298   : > { %v1708_v9 = vadd.f32 %v1707_v7, %v1658_v6  ;;  %v3597_v6 = vor.u32 %v3935_v1, %v3596_v0  ;;  %v3951_v7 = vld [vmem:[#allocation2 + $0xc4] sm:$0xf] }
 0x29a   : > { %v1759_v13 = vpop.f32.mrf.mxu1  ;;  %v1757_v15 = vadd.f32 %v1756_v57, %v1708_v9  ;;  %v3987_v57 = vld [vmem:[#allocation11 + $0x30] sm:$0xff]  ;;  %v3662_v9 = vld [vmem:[#allocation2 + $0xcc] sm:$0xf0] }
 0x29b   : > { %2128 = vmatmul.bf16.gmra.mxu2 %v3485_v51  ;;  %v2080_v17 = vpop.f32.mrf.mxu0  ;;  %4046 = vmatpush.bf16.msra.mxu3 %v3987_v57 }
 0x29c   : > { %v4918_v16 = vadd.f32 %v2077_v63, %v1757_v15  ;;  %2177 = vmatmul.bf16.gmra.mxu3 %v3489_v10  ;;  %v2048_v63 = vadd.f32 %v4877_v12, %v4879_v47  ;;  %v3665_v10 = vor.u32 %v3951_v7, %v3662_v9  ;;  %v3986_v47 = vld [vmem:[#allocation11 + $0x28] sm:$0xff]  ;;  %v3944_v15 = vld [vmem:[#allocation2 + $0x88] sm:$0xf0] }
 0x29d   : > { %2580 = vmatmul.bf16.gmra.mxu1 %v3673_v18  ;;  %v3956_v7 = vld [vmem:[#allocation2 + $0xe8] sm:$0xf0] }
 0x29e   : > { %v1661_v21 = vpop.f32.mrf.mxu2 }
 0x29f   : > { %v1710_v22 = vpop.f32.mrf.mxu3  ;;  %4047 = vmatpush.bf16.msra.mxu3 %v3986_v47 }
 0x2a0   : > { %v1711_v23 = vadd.f32 %v1710_v22, %v1661_v21 }
 0x2a2   : > { %v1761_v48 = vpop.f32.mrf.mxu1  ;;  %v1760_v25 = vadd.f32 %v1759_v13, %v1711_v23  ;;  %v3632_v13 = vld [vmem:[#allocation2 + $0x80] sm:$0xf] }
 0x2a3   : > { %v2082_v39 = vpop.f32.mrf.mxu0  ;;  %v3633_v21 = vor.u32 %v3944_v15, %v3632_v13 }
 0x2a4   : > { %v4920_v27 = vadd.f32 %v2080_v17, %v1760_v25  ;;  %v2053_v17 = vadd.f32 %v4886_v32, %v4888_v49  ;;  %v3644_v25 = vld [vmem:[#allocation2 + $0x98] sm:$0xf]  ;;  %v2058_v32 = vadd.f32 %v4895_v62, %v4897_v30 }
 0x2a6   : > { %v1663_v35 = vpop.f32.mrf.mxu2 }
 0x2a7   : > { %v1712_v37 = vpop.f32.mrf.mxu3  ;;  %2624 = vmatmul.bf16.gmra.mxu0 %v3665_v10 }
 0x2a8   : > { %v1713_v36 = vadd.f32 %v1712_v37, %v1663_v35  ;;  %v3984_v37 = vld [vmem:[#allocation11 + $0x18] sm:$0xff] }
 0x2aa   : > { %v4922_v42 = vpop.f32.mrf.mxu1  ;;  %v1762_v43 = vadd.f32 %v1761_v48, %v1713_v36  ;;  %v3985_v48 = vld [vmem:[#allocation11 + $0x20] sm:$0xff] }
 0x2ab   : > { %2648 = vmatmul.bf16.vlgmr.msra.gmra.mxu2 %v3609_v38  ;;  %4048 = vmatpush.bf16.msra.mxu3 %v3985_v48  ;;  %v3656_v36 = vld [vmem:[#allocation2 + $0xb0] sm:$0xf]  ;;  %v3950_v38 = vld [vmem:[#allocation2 + $0xb8] sm:$0xf0] }
 0x2ac   : > { %v4924_v45 = vadd.f32 %v2082_v39, %v1762_v43  ;;  %v3657_v30 = vor.u32 %v3950_v38, %v3656_v36 }
 0x2ad   : > { %2629 = vmatmul.bf16.vlgmr.msrb.gmra.mxu1 %v3677_v41 }
 0x2ae   : > { %2812 = vmatpush.bf16.msrb.mxu1 %v3988_v26  ;;  %v2094_v52 = vpop.f32.mrf.mxu2  ;;  %v3947_v26 = vld [vmem:[#allocation2 + $0xa0] sm:$0xf0] }
 0x2af   : > { %v4927_v3 = vadd.f32 %v2094_v52, %v4875_v11  ;;  %v3645_v31 = vor.u32 %v3947_v26, %v3644_v25  ;;  %4049 = vmatpush.bf16.msra.mxu3 %v3984_v37  ;;  %v3668_v52 = vld [vmem:[#allocation2 + $0xc8] sm:$0xf] }
 0x2b2   : > { %v4929_v56 = vpop.f32.mrf.mxu1  ;;  %2813 = vmatpush.bf16.msrb.mxu1 %v3987_v57 }
 0x2b3   : > { %4050 = vmatpush.bf16.msra.mxu3 %v3983_v50 }
 0x2b6   : > { %v2096_v2 = vpop.f32.mrf.mxu2  ;;  %2814 = vmatpush.bf16.msrb.mxu1 %v3986_v47 }
 0x2b7   : > { %v4933_v4 = vadd.f32 %v2096_v2, %v2048_v63  ;;  %v2143_v63 = vpop.f32.mrf.mxu3 }
 0x2ba   : > { %v4935_v11 = vpop.f32.mrf.mxu1  ;;  %2815 = vmatpush.bf16.msrb.mxu1 %v3985_v48 }
 0x2bb   : > { %2653 = vmatmul.bf16.gmra.mxu2 %v3621_v5  ;;  %v3982_v5 = vld [vmem:[#allocation11 + $0x8] sm:$0xff] }
 0x2bc   : > { %v2595_v1 = vpop.f32.mrf.mxu0  ;;  %4051 = vmatpush.bf16.msra.mxu3 %v3982_v5 }
 0x2bd   : > { %2643 = vmatmul.bf16.vlgmr.msra.gmra.mxu1 %v3597_v6  ;;  %v3680_v6 = vld [vmem:[#allocation2 + $0xe0] sm:$0xf] }
 0x2be   : > { %v2099_v51 = vpop.f32.mrf.mxu2  ;;  %2816 = vmatpush.bf16.msrb.mxu1 %v3984_v37 }
 0x2bf   : > { %v4938_v18 = vadd.f32 %v2099_v51, %v4884_v29  ;;  %v3681_v51 = vor.u32 %v3956_v7, %v3680_v6  ;;  %v2145_v10 = vpop.f32.mrf.mxu3 }
 0x2c2   : > { %v4940_v12 = vpop.f32.mrf.mxu1  ;;  %2817 = vmatpush.bf16.msrb.mxu1 %v3983_v50 }
 0x2c4   : > { %v2597_v13 = vpop.f32.mrf.mxu0 }
 0x2c6   : > { %v2101_v19 = vpop.f32.mrf.mxu2  ;;  %2818 = vmatpush.bf16.msrb.mxu1 %v3982_v5 }
 0x2c7   : > { %v4944_v20 = vadd.f32 %v2101_v19, %v2053_v17  ;;  %v2148_v19 = vpop.f32.mrf.mxu3 }
 0x2c8   : > { %v2149_v50 = vadd.f32 %v2148_v19, %v4938_v18  ;;  %v2596_v18 = vadd.f32 %v2595_v1, %v4922_v42  ;;  %v2144_v19 = vadd.f32 %v2143_v63, %v4927_v3  ;;  %v2146_v3 = vadd.f32 %v2145_v10, %v4933_v4 }
 0x2ca   : > { %v4946_v22 = vpop.f32.mrf.mxu1 }
 0x2cb   : > { %2658 = vmatmul.bf16.gmra.mxu2 %v3633_v21 }
 0x2ce   : > { %v2104_v29 = vpop.f32.mrf.mxu2 }
 0x2cf   : > { %v4949_v40 = vadd.f32 %v2104_v29, %v4893_v60  ;;  %v3981_v29 = vld [vmem:[#allocation11] sm:$0xff]  ;;  %v2150_v26 = vpop.f32.mrf.mxu3 }
 0x2d0   : > { %4052 = vmatpush.bf16.msra.mxu3 %v3981_v29  ;;  %2819 = vmatpush.bf16.msrb.mxu1 %v3981_v29 }
 0x2d2   : > { %v4951_v23 = vpop.f32.mrf.mxu1 }
 0x2d4   : > { %v2600_v21 = vpop.f32.mrf.mxu0 }
 0x2d6   : > { %v2106_v49 = vpop.f32.mrf.mxu2 }
 0x2d7   : > { %v4955_v28 = vadd.f32 %v2106_v49, %v2058_v32 }
 0x2da   : > { %v4957_v33 = vpop.f32.mrf.mxu1 }
 0x2db   : > { %2663 = vmatmul.bf16.gmra.mxu2 %v3645_v31 }
 0x2dc   : > { %v2602_v32 = vpop.f32.mrf.mxu0 }
 0x2dd   : > { %v2603_v5 = vadd.f32 %v2602_v32, %v4940_v12 }
 0x2de   : > { %v2109_v34 = vpop.f32.mrf.mxu2 }
 0x2df   : > { %v4960_v60 = vadd.f32 %v2109_v34, %v4901_v24  ;;  %v2153_v34 = vpop.f32.mrf.mxu3 }
 0x2e2   : > { %v4962_v35 = vpop.f32.mrf.mxu1 }
 0x2e4   : > { %v2605_v38 = vpop.f32.mrf.mxu0 }
 0x2e5   : > { %v2606_v32 = vadd.f32 %v2605_v38, %v4946_v22 }
 0x2e6   : > { %v2111_v39 = vpop.f32.mrf.mxu2 }
 0x2e7   : > { %v4965_v62 = vadd.f32 %v2111_v39, %v4905_v54  ;;  %v3669_v54 = vor.u32 %v3953_v55, %v3668_v52  ;;  %v2155_v55 = vpop.f32.mrf.mxu3 }
 0x2ea   : > { %v4967_v41 = vpop.f32.mrf.mxu1 }
 0x2eb   : > { %2668 = vmatmul.bf16.gmra.mxu2 %v3657_v30 }
 0x2ee   : > { %v2114_v43 = vpop.f32.mrf.mxu2 }
 0x2ef   : > { %v4970_v46 = vadd.f32 %v2114_v43, %v4908_v53 }
 0x2f2   : > { %v4972_v24 = vpop.f32.mrf.mxu1 }
 0x2f6   : > { %v2116_v57 = vpop.f32.mrf.mxu2 }
 0x2f7   : > { %v4975_v58 = vadd.f32 %v2116_v57, %v4910_v14 }
 0x2fa   : > { %v4977_v61 = vpop.f32.mrf.mxu1 }
 0x2fb   : > { %2673 = vmatmul.bf16.gmra.mxu2 %v3669_v54  ;;  %v2607_v54 = vpop.f32.mrf.mxu0 }
 0x2fc   : > { %v2608_v22 = vadd.f32 %v2607_v54, %v4951_v23 }
 0x2fe   : > { %v2119_v0 = vpop.f32.mrf.mxu2 }
 0x2ff   : > { %v4980_v53 = vadd.f32 %v2119_v0, %v4912_v8 }
 0x302   : > { %v4982_v2 = vpop.f32.mrf.mxu1 }
 0x306   : > { %v2121_v9 = vpop.f32.mrf.mxu2 }
 0x307   : > { %v4985_v14 = vadd.f32 %v2121_v9, %v4914_v44 }
 0x30a   : > { %v4987_v47 = vpop.f32.mrf.mxu1 }
 0x30b   : > { %2678 = vmatmul.bf16.gmra.mxu2 %v3681_v51 }
 0x30e   : > { %v2124_v8 = vpop.f32.mrf.mxu2 }
 0x30f   : > { %v4990_v15 = vadd.f32 %v2124_v8, %v4916_v59 }
 0x312   : > { %v4992_v17 = vpop.f32.mrf.mxu1 }
 0x316   : > { %v2126_v48 = vpop.f32.mrf.mxu2 }
 0x317   : > { %v4995_v25 = vadd.f32 %v2126_v48, %v4918_v16  ;;  %v2601_v16 = vadd.f32 %v2600_v21, %v4935_v11  ;;  %v2151_v11 = vadd.f32 %v2150_v26, %v4944_v20  ;;  %v2158_v21 = vpop.f32.mrf.mxu3  ;;  %v2610_v48 = vpop.f32.mrf.mxu0  ;;  %v2154_v26 = vadd.f32 %v2153_v34, %v4949_v40 }
 0x318   : > { %v2156_v34 = vadd.f32 %v2155_v55, %v4955_v28 }
 0x31a   : > { %v2581_v44 = vpop.f32.mrf.mxu1 }
 0x31e   : > { %v2129_v49 = vpop.f32.mrf.mxu2 }
 0x31f   : > { %v4998_v31 = vadd.f32 %v2129_v49, %v4920_v27  ;;  %v2612_v38 = vpop.f32.mrf.mxu0 }
 0x322   : > { %v2583_v59 = vpop.f32.mrf.mxu1 }
 0x326   : > { %v2131_v37 = vpop.f32.mrf.mxu2 }
 0x327   : > { %v5001_v36 = vadd.f32 %v2131_v37, %v4924_v45  ;;  %v5013_v45 = vld [vmem:[%s5155_s5] ss:$0 sm:$0xff]  ;;  %v2598_v37 = vadd.f32 %v2597_v13, %v4929_v56  ;;  %v2615_v55 = vpop.f32.mrf.mxu0 }
 0x32a   : > { %v2630_v39 = vpop.f32.mrf.mxu1 }
 0x32b   : > { %v5003_v30 = vadd.f32 %v2630_v39, %v2581_v44 }
 0x32e   : > { %v2649_v43 = vpop.f32.mrf.mxu2 }
 0x32f   : > { %v2650_v52 = vadd.f32 %v2649_v43, %v2601_v16  ;;  %v2160_v43 = vpop.f32.mrf.mxu3 }
 0x331   : > { %v2686_v57 = vadd.f32 %v2650_v52, %v2149_v50 }
 0x332   : > { %v2632_v27 = vpop.f32.mrf.mxu1 }
 0x333   : > { %v5007_v0 = vadd.f32 %v2632_v27, %v2583_v59  ;;  %v2706_v9 = vadd.f32 %v5013_v45, %v2686_v57 }
 0x335   : > { %v2722_v49 = vmax.f32 %v2706_v9, 0.0  ;;  %v2159_v9 = vadd.f32 %v2158_v21, %v4960_v60  ;;  %v2616_v60 = vadd.f32 %v2615_v55, %v4967_v41 }
 0x336   : > { %v2651_v6 = vpop.f32.mrf.mxu2 }
 0x337   : > { %v2652_v7 = vadd.f32 %v2651_v6, %v2603_v5  ;;  %v2163_v54 = vpop.f32.mrf.mxu3 }
 0x339   : > { %v2687_v51 = vadd.f32 %v2652_v7, %v2151_v11  ;;  %v2611_v11 = vadd.f32 %v2610_v48, %v4957_v33 }
 0x33a   : > { %v2644_v8 = vpop.f32.mrf.mxu1 }
 0x33b   : > { %v2645_v29 = vadd.f32 %v2644_v8, %v2596_v18  ;;  %v2707_v12 = vadd.f32 %v5013_v45, %v2687_v51 }
 0x33d   : > { %v2684_v44 = vadd.f32 %v2645_v29, %v2144_v19  ;;  %v2723_v59 = vmax.f32 %v2707_v12, 0.0  ;;  %v2613_v19 = vadd.f32 %v2612_v38, %v4962_v35  ;;  %v2161_v12 = vadd.f32 %v2160_v43, %v4965_v62 }
 0x33e   : > { %v2654_v20 = vpop.f32.mrf.mxu2 }
 0x33f   : > { %v2737_v42 = vpack.c.bf16 %v2723_v59, %v2722_v49  ;;  %v2655_v1 = vadd.f32 %v2654_v20, %v2606_v32  ;;  %v2704_v50 = vadd.f32 %v5013_v45, %v2684_v44  ;;  %v2165_v32 = vpop.f32.mrf.mxu3  ;;  %v2617_v49 = vpop.f32.mrf.mxu0 }
 0x341   : > { %v2688_v39 = vadd.f32 %v2655_v1, %v2154_v26  ;;  %2825 = vmatmul.bf16.vlgmr.msra.gmra.mxu3 %v2737_v42  ;;  %v2720_v56 = vmax.f32 %v2704_v50, 0.0  ;;  %v2164_v42 = vadd.f32 %v2163_v54, %v4970_v46 }
 0x342   : > { %v2646_v16 = vpop.f32.mrf.mxu1 }
 0x343   : > { %v2647_v63 = vadd.f32 %v2646_v16, %v2598_v37  ;;  %v2708_v5 = vadd.f32 %v5013_v45, %v2688_v39  ;;  %v2618_v16 = vadd.f32 %v2617_v49, %v4972_v24 }
 0x345   : > { %v2685_v52 = vadd.f32 %v2647_v63, %v2146_v3  ;;  %v2724_v7 = vmax.f32 %v2708_v5, 0.0  ;;  %v2166_v63 = vadd.f32 %v2165_v32, %v4975_v58 }
 0x346   : > { %v2656_v40 = vpop.f32.mrf.mxu2 }
 0x347   : > { %v2705_v57 = vadd.f32 %v5013_v45, %v2685_v52  ;;  %v2657_v27 = vadd.f32 %v2656_v40, %v2608_v22  ;;  %v2168_v62 = vpop.f32.mrf.mxu3  ;;  %v2620_v39 = vpop.f32.mrf.mxu0 }
 0x348   : > { %v2621_v46 = vadd.f32 %v2620_v39, %v4977_v61 }
 0x349   : > { %v2721_v13 = vmax.f32 %v2705_v57, 0.0  ;;  %v2689_v6 = vadd.f32 %v2657_v27, %v2156_v34  ;;  %v2169_v27 = vadd.f32 %v2168_v62, %v4980_v53 }
 0x34b   : > { %v2736_v4 = vpack.c.bf16 %v2721_v13, %v2720_v56  ;;  %v2709_v10 = vadd.f32 %v5013_v45, %v2689_v6 }
 0x34d   : > { %2820 = vmatmul.bf16.vlgmr.msrb.gmra.mxu1 %v2736_v4  ;;  %v2725_v23 = vmax.f32 %v2709_v10, 0.0 }
 0x34e   : > { %v2659_v18 = vpop.f32.mrf.mxu2 }
 0x34f   : > { %v2660_v51 = vadd.f32 %v2659_v18, %v2611_v11  ;;  %v2738_v28 = vpack.c.bf16 %v2725_v23, %v2724_v7  ;;  %v2170_v22 = vpop.f32.mrf.mxu3  ;;  %v2622_v40 = vpop.f32.mrf.mxu0 }
 0x350   : > { %v2623_v58 = vadd.f32 %v2622_v40, %v4982_v2  ;;  %v2171_v4 = vadd.f32 %v2170_v22, %v4985_v14 }
 0x351   : > { %v2690_v8 = vadd.f32 %v2660_v51, %v2159_v9  ;;  %2830 = vmatmul.bf16.gmra.mxu3 %v2738_v28 }
 0x353   : > { %v2710_v33 = vadd.f32 %v5013_v45, %v2690_v8 }
 0x355   : > { %v2726_v21 = vmax.f32 %v2710_v33, 0.0 }
 0x356   : > { %v2661_v29 = vpop.f32.mrf.mxu2 }
 0x357   : > { %v2662_v44 = vadd.f32 %v2661_v29, %v2613_v19  ;;  %v2173_v5 = vpop.f32.mrf.mxu3  ;;  %v2625_v11 = vpop.f32.mrf.mxu0 }
 0x358   : > { %v2626_v54 = vadd.f32 %v2625_v11, %v4987_v47  ;;  %v2174_v51 = vadd.f32 %v2173_v5, %v4990_v15 }
 0x359   : > { %v2691_v48 = vadd.f32 %v2662_v44, %v2161_v12 }
 0x35b   : > { %v2711_v59 = vadd.f32 %v5013_v45, %v2691_v48 }
 0x35d   : > { %v2727_v20 = vmax.f32 %v2711_v59, 0.0 }
 0x35e   : > { %v2664_v26 = vpop.f32.mrf.mxu2 }
 0x35f   : > { %v2665_v1 = vadd.f32 %v2664_v26, %v2616_v60  ;;  %v2739_v35 = vpack.c.bf16 %v2727_v20, %v2726_v21  ;;  %v2175_v55 = vpop.f32.mrf.mxu3  ;;  %v2627_v14 = vpop.f32.mrf.mxu0 }
 0x360   : > { %v2628_v19 = vadd.f32 %v2627_v14, %v4992_v17  ;;  %v2176_v12 = vadd.f32 %v2175_v55, %v4995_v25 }
 0x361   : > { %v2692_v37 = vadd.f32 %v2665_v1, %v2164_v42  ;;  %2835 = vmatmul.bf16.gmra.mxu3 %v2739_v35 }
 0x363   : > { %v2712_v50 = vadd.f32 %v5013_v45, %v2692_v37 }
 0x365   : > { %v2728_v38 = vmax.f32 %v2712_v50, 0.0 }
 0x366   : > { %v2666_v3 = vpop.f32.mrf.mxu2 }
 0x367   : > { %v2667_v43 = vadd.f32 %v2666_v3, %v2618_v16  ;;  %v2178_v33 = vpop.f32.mrf.mxu3  ;;  %v5064_v3 = vld [vmem:[%s5157_s7] ss:$0 sm:$0xff] }
 0x368   : > { %v2179_v60 = vadd.f32 %v2178_v33, %v4998_v31 }
 0x369   : > { %v2693_v41 = vadd.f32 %v2667_v43, %v2166_v63  ;;  %v3991_v43 = vld [vmem:[%s4652_s18] sm:$0xff]  }
 0x36b   : > { %v2713_v52 = vadd.f32 %v5013_v45, %v2693_v41 }
 0x36d   : > { %v2729_v57 = vmax.f32 %v2713_v52, 0.0 }
 0x36e   : > { %v2669_v34 = vpop.f32.mrf.mxu2 }
 0x36f   : > { %v2670_v56 = vadd.f32 %v2669_v34, %v2621_v46  ;;  %v2740_v24 = vpack.c.bf16 %v2729_v57, %v2728_v38  ;;  %v2180_v26 = vpop.f32.mrf.mxu3 }
 0x370   : > { %v2181_v42 = vadd.f32 %v2180_v26, %v5001_v36 }
 0x371   : > { %v2694_v13 = vadd.f32 %v2670_v56, %v2169_v27  ;;  %2840 = vmatmul.bf16.gmra.mxu3 %v2740_v24  ;;  %v3993_v56 = vunpack.c.h.bf16 %v3991_v43  ;;  %v4023_v24 = vld [vmem:[%s4652_s18 + $0x10] sm:$0xff]  }
 0x373   : > { %v2714_v61 = vadd.f32 %v5013_v45, %v2694_v13 }
 0x375   : > { %v2730_v53 = vmax.f32 %v2714_v61, 0.0 }
 0x376   : > { %v2671_v6 = vpop.f32.mrf.mxu2 }
 0x377   : > { %v2672_v10 = vadd.f32 %v2671_v6, %v2623_v58  ;;  %v4000_v6 = vunpack.c.l.bf16 %v4023_v24 }
 0x379   : > { %v2695_v7 = vadd.f32 %v2672_v10, %v2171_v4 }
 0x37b   : > { %v2715_v23 = vadd.f32 %v5013_v45, %v2695_v7 }
 0x37d   : > { %v2731_v18 = vmax.f32 %v2715_v23, 0.0 }
 0x37e   : > { %v2674_v9 = vpop.f32.mrf.mxu2 }
 0x37f   : > { %v2675_v28 = vadd.f32 %v2674_v9, %v2626_v54  ;;  %v2741_v2 = vpack.c.bf16 %v2731_v18, %v2730_v53  ;;  %v4001_v54 = vunpack.c.h.bf16 %v4023_v24 }
 0x381   : > { %v2696_v8 = vadd.f32 %v2675_v28, %v2174_v51  ;;  %2845 = vmatmul.bf16.gmra.mxu3 %v2741_v2  ;;  %v4024_v51 = vld [vmem:[%s4652_s18 + $0x18] sm:$0xff]  }
 0x382   : > { %v4004_v2 = vunpack.c.l.bf16 %v4024_v51 }
 0x383   : > { %v2716_v32 = vadd.f32 %v5013_v45, %v2696_v8 }
 0x385   : > { %v2732_v49 = vmax.f32 %v2716_v32, 0.0 }
 0x386   : > { %v2676_v29 = vpop.f32.mrf.mxu2 }
 0x387   : > { %v2677_v44 = vadd.f32 %v2676_v29, %v2628_v19  ;;  %v4005_v29 = vunpack.c.h.bf16 %v4024_v51 }
 0x389   : > { %v2697_v47 = vadd.f32 %v2677_v44, %v2176_v12 }
 0x38b   : > { %v2717_v48 = vadd.f32 %v5013_v45, %v2697_v47  ;;  %v4025_v47 = vld [vmem:[%s4652_s18 + $0x20] sm:$0xff]  }
 0x38d   : > { %v2733_v15 = vmax.f32 %v2717_v48, 0.0  ;;  %v4008_v48 = vunpack.c.l.bf16 %v4025_v47 }
 0x38e   : > { %v2679_v59 = vpop.f32.mrf.mxu2 }
 0x38f   : > { %v2680_v21 = vadd.f32 %v2679_v59, %v5003_v30  ;;  %v2742_v20 = vpack.c.bf16 %v2733_v15, %v2732_v49  ;;  %v4022_v30 = vld [vmem:[%s4652_s18 + $0x8] sm:$0xff]  }
 0x390   : > { %v3996_v63 = vunpack.c.l.bf16 %v4022_v30  ;;  %v3997_v46 = vunpack.c.h.bf16 %v4022_v30 }
 0x391   : > { %v2698_v17 = vadd.f32 %v2680_v21, %v2179_v60  ;;  %2850 = vmatmul.bf16.gmra.mxu3 %v2742_v20  ;;  %v4009_v21 = vunpack.c.h.bf16 %v4025_v47 }
 0x393   : > { %v2718_v35 = vadd.f32 %v5013_v45, %v2698_v17 }
 0x395   : > { %v2734_v31 = vmax.f32 %v2718_v35, 0.0 }
 0x396   : > { %v2681_v25 = vpop.f32.mrf.mxu2 }
 0x397   : > { %v2682_v1 = vadd.f32 %v2681_v25, %v5007_v0  ;;  %v4026_v25 = vld [vmem:[%s4652_s18 + $0x28] sm:$0xff]  }
 0x399   : > { %v2699_v37 = vadd.f32 %v2682_v1, %v2181_v42  ;;  %v4012_v1 = vunpack.c.l.bf16 %v4026_v25 }
 0x39b   : > { %v2719_v62 = vadd.f32 %v5013_v45, %v2699_v37  ;;  %v3992_v45 = vunpack.c.l.bf16 %v3991_v43 }
 0x39d   : > { %v2735_v39 = vmax.f32 %v2719_v62, 0.0 }
 0x39f   : > { %v2743_v16 = vpack.c.bf16 %v2735_v39, %v2734_v31  ;;  %v4013_v39 = vunpack.c.h.bf16 %v4026_v25 }
 0x3a1   : > { %2855 = vmatmul.bf16.gmra.mxu3 %v2743_v16 }
 0x3c4   : > { %v2826_v36 = vpop.f32.mrf.mxu3 }
 0x3c5   : > { %v2827_v0 = vadd.f32 %v5064_v3, %v2826_v36  ;;  %v4027_v36 = vld [vmem:[%s4652_s18 + $0x30] sm:$0xff]  }
 0x3c6   : > { %v4016_v43 = vunpack.c.l.bf16 %v4027_v36 }
 0x3c7   : > { %v2895_v50 = vadd.f32 %v3996_v63, %v2827_v0 }
 0x3c9   : > { %v2911_v41 = vmax.f32 %v2895_v50, 0.0 }
 0x3ca   : > { %v2821_v52 = vpop.f32.mrf.mxu1 }
 0x3cb   : > { %v2822_v22 = vadd.f32 %v5064_v3, %v2821_v52  ;;  %2927 = vst [vmem:[%s4862_s17 + $0x10] sm:$0xff] %v2911_v41 }
 0x3cc   : > { %v2828_v57 = vpop.f32.mrf.mxu3 }
 0x3cd   : > { %v2893_v38 = vadd.f32 %v3992_v45, %v2822_v22  ;;  %v2829_v40 = vadd.f32 %v5064_v3, %v2828_v57  ;;  %v4017_v22 = vunpack.c.h.bf16 %v4027_v36 }
 0x3cf   : > { %v2909_v34 = vmax.f32 %v2893_v38, 0.0  ;;  %v2896_v27 = vadd.f32 %v3997_v46, %v2829_v40  ;;  %v4028_v40 = vld [vmem:[%s4652_s18 + $0x38] sm:$0xff]  }
 0x3d1   : > { %2925 = vst [vmem:[%s4862_s17] sm:$0xff] %v2909_v34  ;;  %v2912_v13 = vmax.f32 %v2896_v27, 0.0  ;;  %v4020_v27 = vunpack.c.l.bf16 %v4028_v40 }
 0x3d2   : > { %v2823_v58 = vpop.f32.mrf.mxu1 }
 0x3d3   : > { %v2824_v5 = vadd.f32 %v5064_v3, %v2823_v58  ;;  %2928 = vst [vmem:[%s4862_s17 + $0x18] sm:$0xff] %v2912_v13 }
 0x3d4   : > { %v2831_v10 = vpop.f32.mrf.mxu3 }
 0x3d5   : > { %v2894_v4 = vadd.f32 %v3993_v56, %v2824_v5  ;;  %v2832_v11 = vadd.f32 %v5064_v3, %v2831_v10  ;;  %v4021_v5 = vunpack.c.h.bf16 %v4028_v40 }
 0x3d7   : > { %v2910_v61 = vmax.f32 %v2894_v4, 0.0  ;;  %v2897_v7 = vadd.f32 %v4000_v6, %v2832_v11 }
 0x3d9   : > { %2926 = vst [vmem:[%s4862_s17 + $0x8] sm:$0xff] %v2910_v61  ;;  %v2913_v23 = vmax.f32 %v2897_v7, 0.0 }
 0x3db   : > { %2929 = vst [vmem:[%s4862_s17 + $0x20] sm:$0xff] %v2913_v23 }
 0x3dc   : > { %v2833_v53 = vpop.f32.mrf.mxu3 }
 0x3dd   : > { %v2834_v18 = vadd.f32 %v5064_v3, %v2833_v53 }
 0x3df   : > { %v2898_v9 = vadd.f32 %v4001_v54, %v2834_v18 }
 0x3e1   : > { %v2914_v28 = vmax.f32 %v2898_v9, 0.0 }
 0x3e3   : > { %2930 = vst [vmem:[%s4862_s17 + $0x28] sm:$0xff] %v2914_v28 }
 0x3e4   : > { %v2836_v55 = vpop.f32.mrf.mxu3 }
 0x3e5   : > { %v2837_v8 = vadd.f32 %v5064_v3, %v2836_v55 }
 0x3e7   : > { %v2899_v14 = vadd.f32 %v4004_v2, %v2837_v8 }
 0x3e9   : > { %v2915_v19 = vmax.f32 %v2899_v14, 0.0 }
 0x3eb   : > { %2931 = vst [vmem:[%s4862_s17 + $0x30] sm:$0xff] %v2915_v19 }
 0x3ec   : > { %v2838_v12 = vpop.f32.mrf.mxu3 }
 0x3ed   : > { %v2839_v44 = vadd.f32 %v5064_v3, %v2838_v12 }
 0x3ef   : > { %v2900_v32 = vadd.f32 %v4005_v29, %v2839_v44 }
 0x3f1   : > { %v2916_v33 = vmax.f32 %v2900_v32, 0.0 }
 0x3f3   : > { %2932 = vst [vmem:[%s4862_s17 + $0x38] sm:$0xff] %v2916_v33 }
 0x3f4   : > { %v2841_v49 = vpop.f32.mrf.mxu3 }
 0x3f5   : > { %v2842_v15 = vadd.f32 %v5064_v3, %v2841_v49 }
 0x3f7   : > { %v2901_v59 = vadd.f32 %v4008_v48, %v2842_v15 }
 0x3f9   : > { %v2917_v60 = vmax.f32 %v2901_v59, 0.0 }
 0x3fb   : > { %2933 = vst [vmem:[%s4862_s17 + $0x40] sm:$0xff] %v2917_v60 }
 0x3fc   : > { %v2843_v20 = vpop.f32.mrf.mxu3 }
 0x3fd   : > { %v2844_v17 = vadd.f32 %v5064_v3, %v2843_v20 }
 0x3ff   : > { %v2902_v26 = vadd.f32 %v4009_v21, %v2844_v17 }
 0x401   : > { %v2918_v42 = vmax.f32 %v2902_v26, 0.0 }
 0x403   : > { %2934 = vst [vmem:[%s4862_s17 + $0x48] sm:$0xff] %v2918_v42 }
 0x404   : > { %v2846_v35 = vpop.f32.mrf.mxu3 }
 0x405   : > { %v2847_v37 = vadd.f32 %v5064_v3, %v2846_v35 }
 0x407   : > { %v2903_v62 = vadd.f32 %v4012_v1, %v2847_v37 }
 0x409   : > { %v2919_v31 = vmax.f32 %v2903_v62, 0.0 }
 0x40b   : > { %2935 = vst [vmem:[%s4862_s17 + $0x50] sm:$0xff] %v2919_v31 }
 0x40c   : > { %v2848_v16 = vpop.f32.mrf.mxu3 }
 0x40d   : > { %v2849_v30 = vadd.f32 %v5064_v3, %v2848_v16 }
 0x40f   : > { %v2904_v63 = vadd.f32 %v4013_v39, %v2849_v30 }
 0x411   : > { %v2920_v0 = vmax.f32 %v2904_v63, 0.0 }
 0x413   : > { %2936 = vst [vmem:[%s4862_s17 + $0x58] sm:$0xff] %v2920_v0 }
 0x414   : > { %v2851_v50 = vpop.f32.mrf.mxu3 }
 0x415   : > { %v2852_v45 = vadd.f32 %v5064_v3, %v2851_v50 }
 0x417   : > { %v2905_v41 = vadd.f32 %v4016_v43, %v2852_v45 }
 0x419   : > { %v2921_v52 = vmax.f32 %v2905_v41, 0.0 }
 0x41b   : > { %2937 = vst [vmem:[%s4862_s17 + $0x60] sm:$0xff] %v2921_v52 }
 0x41c   : > { %v2853_v46 = vpop.f32.mrf.mxu3 }
 0x41d   : > { %v2854_v38 = vadd.f32 %v5064_v3, %v2853_v46 }
 0x41f   : > { %v2906_v57 = vadd.f32 %v4017_v22, %v2854_v38 }
 0x421   : > { %v2922_v34 = vmax.f32 %v2906_v57, 0.0 }
 0x423   : > { %2938 = vst [vmem:[%s4862_s17 + $0x68] sm:$0xff] %v2922_v34 }
 0x424   : > { %v2856_v56 = vpop.f32.mrf.mxu3 }
 0x425   : > { %v2857_v24 = vadd.f32 %v5064_v3, %v2856_v56 }
 0x427   : > { %v2907_v13 = vadd.f32 %v4020_v27, %v2857_v24 }
 0x429   : > { %v2923_v58 = vmax.f32 %v2907_v13, 0.0 }
 0x42b   : > { %2939 = vst [vmem:[%s4862_s17 + $0x70] sm:$0xff] %v2923_v58 }
 0x42c   : > { %v2858_v6 = vpop.f32.mrf.mxu3 }
 0x42d   : > { %v2859_v4 = vadd.f32 %v5064_v3, %v2858_v6 }
 0x42f   : > { %v2908_v10 = vadd.f32 %v4021_v5, %v2859_v4 }
 0x431   : > { %v2924_v11 = vmax.f32 %v2908_v10, 0.0 }
 0x433   : > { %2940 = vst [vmem:[%s4862_s17 + $0x78] sm:$0xff] %v2924_v11 }
 0x434   : > { %4353 = shalt.err (!%p4350_p4)
}
 0x435   : > { %s4445_s6 = smov 128   ;;  %s4446_s17 = smov 8  }
 0x436   : > { %4069 = dma.vmem_to_hbm [thread:$0]  (%p4597_p2), %s2958_s30, 2048, %s2960_s0, %s2942_s8, %s4445_s6, %s4445_s6, %s4446_s17  }
 0x437 PF: > { %s5215_s27 = sld [smem:[#allocation21_spill]] }
 0x438   : > { %s5216_s16 = sld [smem:[#allocation18_spill]] }
 0x43d   : > { %p4099_p6 = scmp.ge.s32.totalorder %s5215_s27, 2 }
 0x43e   : > { %s2974_s24 = sand.u32 1, %s5216_s16  }
 0x43f   : > { %p4089_p8 = pnand %p4099_p6, %p4546_p5  ;;  %s2975_s25 = scalar_lea.sflag [#allocation5], %s2974_s24 }
 0x441   : > { %p4090_p9 = pneg %p4089_p8 }
 0x443   : > { %4403 = dma.done.wait (%p4090_p9), %s2975_s25, 2048  }
 0x444   : > { %4405 = vsyncadd (%p4090_p9), %s2975_s25, 4294965248  ;;  %s28_s12 = sadd.s32 1, %s5215_s27   ;;  %s5218_s9 = sld [smem:[#allocation19_spill]] }
 0x445   : > { %p25_p1 = scmp.ge.s32.totalorder %s28_s12, 6   ;;  %s5219_s29 = sld [smem:[#allocation26_spill]] }
 0x446   : > { %s5220_s22 = sld [smem:[#allocation23_spill]]  ;;  %s5222_s27 = smov %s4412_s28 }
 0x447   : > { %s5221_s23 = sld [smem:[#allocation25_spill]]  ;;  %s5224_s30 = smov %s4428_s10 }
 0x449   :  { %27 = sbr.rel (!%p25_p1) target bundleno = 16 (0x10), region = 135 }
 0x44a   : > { %s5223_s28 = smov %s5218_s9  ;;  %s5225_s9 = smov %s4432_s11 }
 0x44c   : > { %s5226_s10 = smov %s5220_s22 }
 0x44d   : > { %s5227_s11 = smov %s5221_s23 }
 0x44e   :  { %2981 = vsyncpa [#allocation4], 1 }
 0x44f   :  { %2983 = vsyncpa [#allocation4 + $0x1], 1 }
 0x450   :  { %2984 = vsyncpa [#allocation7], 1 }
 0x451   :  { %2986 = vsyncpa [#allocation7 + $0x1], 1 }
 0x452   :  { %2987 = vsyncpa [#allocation10], 1 }
 0x453   :  { %2988 = vsyncpa [#allocation5], 1 }
 0x454   :  { %2990 = vsyncpa [#allocation5 + $0x1], 1 }

</bundles_post_ra>
